<compile_context>
chip_gen: v5e
topology: v5e:2x2
jax: 0.10.0
libtpu: 0.0.40
codegen_flags: <defaults>
</compile_context>

<pallas_src>
import functools

import jax
import jax.numpy as jnp
from jax import lax
from jax.experimental import pallas as pl
from jax.experimental.pallas import tpu as pltpu

# ---------------- model hyper-params (consistent with the module) -----------
NUM_ATOM_TYPE = 119
NUM_CHIRALITY_TAG = 3
NUM_BOND_TYPE = 5
NUM_BOND_DIRECTION = 3

NUM_LAYER = 5
EMB_DIM = 32
FEAT_DIM = 64          # feat_dim // 2 = 32
OUT_DIM = 2            # task = 'classification'
BN_EPS = 1e-5

LANE = 128                                        # all feature dims padded to 128 lanes
ETAB_ROWS = NUM_BOND_TYPE + NUM_BOND_DIRECTION    # 8
ETAB_PAD = 16                                     # sublane-pad for bf16 MXU alignment


def _round_up(v, m):
    return (v + m - 1) // m * m


def _softplus(x):
    # numerically stable log(1 + exp(x)) == torch.nn.Softplus semantics
    return jnp.maximum(x, 0.0) + jnp.log1p(jnp.exp(-jnp.abs(x)))


# ---------------------------- fused Pallas kernel ----------------------------
def agile_fused_kernel(inv_n, num_layer,
                       adj_ref, cmat_ref, mask_ref, pool_ref, invc_ref, h0_ref,
                       etab_ref, w1_ref, w2_ref, sm_ref,
                       hw_ref, hb_ref,
                       hout_ref, pred_ref):
    """Fused AGILE forward: 5x (GINEConv + BN (+ReLU)) + mean-pool + head.

    adj  : (n_pad, n_pad)  bf16  self-loop-augmented edge counts (target rows)
    cmat : (n_pad, 16)     bf16  per-node [bond-type | bond-dir | 0-pad] counts
    etab : (L, 16, 128)    bf16  stacked [edge_emb1 ; edge_emb2 ; 0] tables
    sm   : (L, 4, 128)     f32   per-layer [b1, b2, bn_gamma, bn_beta]
    """
    adj = adj_ref[...]                         # (n_pad, n_pad) bf16
    cmat = cmat_ref[...]                       # (n_pad, 16)    bf16
    mask = mask_ref[...]                       # (n_pad, 1)     f32 (1 for real nodes)
    h = h0_ref[...]                            # (n_pad, 128)   f32

    for l in range(num_layer):
        sm = sm_ref[l]                         # (4, 128) f32

        # --- GINE aggregation: sum_{j in N(i)} (h_j + e1[type] + e2[dir]) ----
        aggr = (jnp.dot(adj, h.astype(jnp.bfloat16),
                        preferred_element_type=jnp.float32)
                + jnp.dot(cmat, etab_ref[l],
                          preferred_element_type=jnp.float32))

        # --- MLP: Linear -> ReLU -> Linear (bf16 MXU, f32 accumulate) --------
        hid = jnp.dot(aggr.astype(jnp.bfloat16), w1_ref[l],
                      preferred_element_type=jnp.float32) + sm[0:1, :]
        hid = jnp.maximum(hid, 0.0)
        y = jnp.dot(hid.astype(jnp.bfloat16), w2_ref[l],
                    preferred_element_type=jnp.float32) + sm[1:2, :]

        # --- BatchNorm1d (training-mode batch stats over real nodes, f32) ----
        mean = jnp.sum(y * mask, axis=0, keepdims=True) * inv_n
        d = y - mean
        var = jnp.sum(d * d * mask, axis=0, keepdims=True) * inv_n
        y = d * lax.rsqrt(var + BN_EPS) * sm[2:3, :] + sm[3:4, :]

        if l != num_layer - 1:                 # drop_ratio = 0 -> dropout is a no-op
            y = jnp.maximum(y, 0.0)
        h = y

    # --- head: mean-pool -> feat_lin -> (Linear+Softplus)x2 -> Linear --------
    hb = hb_ref[...]                           # (4, 128) f32 biases
    g = jnp.dot(pool_ref[...], h, preferred_element_type=jnp.float32) * invc_ref[...]
    feat = jnp.dot(g.astype(jnp.bfloat16), hw_ref[0],
                   preferred_element_type=jnp.float32) + hb[0:1, :]
    hout_ref[...] = feat

    z = _softplus(jnp.dot(feat.astype(jnp.bfloat16), hw_ref[1],
                          preferred_element_type=jnp.float32) + hb[1:2, :])
    z = _softplus(jnp.dot(z.astype(jnp.bfloat16), hw_ref[2],
                          preferred_element_type=jnp.float32) + hb[2:3, :])
    pred_ref[...] = jnp.dot(z.astype(jnp.bfloat16), hw_ref[3],
                            preferred_element_type=jnp.float32) + hb[3:4, :]


# ---------------------------- pallas_call wrapper ----------------------------
def _full_spec(shape):
    nd = len(shape)

    def idx(i):
        return (0,) * nd

    return pl.BlockSpec(shape, idx)


def run_agile_fused(n_real, adj, cmat, mask, pool, inv_cnt, h0,
                    etab, w1, w2, smalls, head_w, head_b):
    g_pad = pool.shape[0]
    args = (adj, cmat, mask, pool, inv_cnt, h0, etab, w1, w2, smalls, head_w, head_b)
    out_shapes = (jax.ShapeDtypeStruct((g_pad, LANE), jnp.float32),
                  jax.ShapeDtypeStruct((g_pad, LANE), jnp.float32))
    return pl.pallas_call(
        functools.partial(agile_fused_kernel, 1.0 / n_real, NUM_LAYER),
        out_shape=out_shapes,
        grid_spec=pltpu.PrefetchScalarGridSpec(
            num_scalar_prefetch=0,
            grid=(1,),
            in_specs=[_full_spec(a.shape) for a in args],
            out_specs=[_full_spec(s.shape) for s in out_shapes],
        ),
        compiler_params=pltpu.CompilerParams(
            dimension_semantics=("arbitrary",),
            vmem_limit_bytes=64 * 1024 * 1024,
        ),
    )(*args)


# ---------------------------- parameter init (deterministic) ----------------
def xavier_uniform(key, shape):
    fan_in, fan_out = shape[0], shape[1]
    bound = jnp.sqrt(6.0 / (fan_in + fan_out))
    return jax.random.uniform(key, shape, jnp.float32, -bound, bound)


def linear_params(key, d_in, d_out):
    k1, k2 = jax.random.split(key)
    bound = 1.0 / jnp.sqrt(d_in)
    w = jax.random.uniform(k1, (d_in, d_out), jnp.float32, -bound, bound)
    b = jax.random.uniform(k2, (1, d_out), jnp.float32, -bound, bound)
    return w, b


def _pad2(a, rows, cols):
    return jnp.pad(a, ((0, rows - a.shape[0]), (0, cols - a.shape[1])))


def init_params(key):
    keys = jax.random.split(key, 8 + NUM_LAYER)
    p = {}
    p["x_emb1"] = xavier_uniform(keys[0], (NUM_ATOM_TYPE, EMB_DIM))
    p["x_emb2"] = xavier_uniform(keys[1], (NUM_CHIRALITY_TAG, EMB_DIM))

    etab, w1s, w2s, smalls = [], [], [], []
    for l in range(NUM_LAYER):
        lk = jax.random.split(keys[2 + l], 6)
        w1, b1 = linear_params(lk[0], EMB_DIM, 2 * EMB_DIM)
        w2, b2 = linear_params(lk[1], 2 * EMB_DIM, EMB_DIM)
        e1 = xavier_uniform(lk[2], (NUM_BOND_TYPE, EMB_DIM))
        e2 = xavier_uniform(lk[3], (NUM_BOND_DIRECTION, EMB_DIM))
        etab.append(_pad2(jnp.concatenate([e1, e2], axis=0), ETAB_PAD, LANE))
        w1s.append(_pad2(w1, LANE, LANE))
        w2s.append(_pad2(w2, LANE, LANE))
        smalls.append(jnp.concatenate([
            _pad2(b1, 1, LANE),
            _pad2(b2, 1, LANE),
            _pad2(jnp.ones((1, EMB_DIM), jnp.float32), 1, LANE),    # BN gamma
            _pad2(jnp.zeros((1, EMB_DIM), jnp.float32), 1, LANE),   # BN beta
        ], axis=0))

    p["etab"] = jnp.stack(etab).astype(jnp.bfloat16)        # (L, 16, 128)
    p["w1"] = jnp.stack(w1s).astype(jnp.bfloat16)           # (L, 128, 128)
    p["w2"] = jnp.stack(w2s).astype(jnp.bfloat16)           # (L, 128, 128)
    p["smalls"] = jnp.stack(smalls)                         # (L, 4, 128) f32

    ki = 2 + NUM_LAYER
    fw, fb = linear_params(keys[ki], EMB_DIM, FEAT_DIM)
    w1h, b1h = linear_params(keys[ki + 1], FEAT_DIM, FEAT_DIM // 2)
    w2h, b2h = linear_params(keys[ki + 2], FEAT_DIM // 2, FEAT_DIM // 2)
    w3h, b3h = linear_params(keys[ki + 3], FEAT_DIM // 2, OUT_DIM)
    p["head_w"] = jnp.stack([_pad2(fw, LANE, LANE), _pad2(w1h, LANE, LANE),
                             _pad2(w2h, LANE, LANE), _pad2(w3h, LANE, LANE)]
                            ).astype(jnp.bfloat16)          # (4, 128, 128)
    p["head_b"] = jnp.concatenate([_pad2(fb, 1, LANE), _pad2(b1h, 1, LANE),
                                   _pad2(b2h, 1, LANE), _pad2(b3h, 1, LANE)],
                                  axis=0)                   # (4, 128) f32
    return p


# ---------------------------- AGILE forward ----------------------------------
def agile_forward(params, x, edge_index, edge_attr, batch, num_graphs):
    n = x.shape[0]
    n_pad = _round_up(n, 8)
    g_pad = _round_up(num_graphs, 8)

    # node embedding lookup (glue) -> padded to 128 lanes
    h0 = params["x_emb1"][x[:, 0]] + params["x_emb2"][x[:, 1]]
    h0 = jnp.pad(h0, ((0, n_pad - n), (0, LANE - EMB_DIM)))

    # add self loops; self-loop edge_attr = [4, 0]
    src = jnp.concatenate([edge_index[0], jnp.arange(n, dtype=edge_index.dtype)])
    tgt = jnp.concatenate([edge_index[1], jnp.arange(n, dtype=edge_index.dtype)])
    etype = jnp.concatenate([edge_attr[:, 0], jnp.full((n,), 4, edge_attr.dtype)])
    edir = jnp.concatenate([edge_attr[:, 1], jnp.zeros((n,), edge_attr.dtype)])

    # layer-invariant aggregation operators via one-hot matmuls (no scatter):
    #   adj[i, j]   = #edges j -> i         (target rows, self loops included)
    #   cmat[i, :8] = per-node bond-type / bond-direction counts
    oh_tgt = (tgt[:, None] == jnp.arange(n_pad)[None, :]).astype(jnp.float32)
    oh_src = (src[:, None] == jnp.arange(n_pad)[None, :]).astype(jnp.float32)
    oh_typ = (etype[:, None] == jnp.arange(NUM_BOND_TYPE)[None, :]).astype(jnp.float32)
    oh_dir = (edir[:, None] == jnp.arange(NUM_BOND_DIRECTION)[None, :]).astype(jnp.float32)
    adj = jnp.dot(oh_tgt.T, oh_src).astype(jnp.bfloat16)           # integer counts: exact in bf16
    cmat = jnp.dot(oh_tgt.T, jnp.concatenate([oh_typ, oh_dir], axis=1))
    cmat = jnp.pad(cmat, ((0, 0), (0, ETAB_PAD - ETAB_ROWS))).astype(jnp.bfloat16)

    # global mean pool as one-hot sum-pool (f32) + inverse counts
    oh_pool = (jnp.arange(g_pad)[:, None] == batch[None, :]).astype(jnp.float32)
    counts = jnp.maximum(oh_pool.sum(axis=1, keepdims=True), 1.0)
    inv_cnt = 1.0 / counts                                          # (g_pad, 1) f32
    pool = jnp.pad(oh_pool, ((0, 0), (0, n_pad - n)))               # (g_pad, n_pad) f32

    # mask of real (non-padded) node rows for BatchNorm statistics
    mask = (jnp.arange(n_pad) < n).astype(jnp.float32)[:, None]

    hout, pred = run_agile_fused(n, adj, cmat, mask, pool, inv_cnt, h0,
                                 params["etab"], params["w1"], params["w2"],
                                 params["smalls"], params["head_w"], params["head_b"])
    return hout[:num_graphs, :FEAT_DIM], pred[:num_graphs, :OUT_DIM]


agile_forward_jit = jax.jit(agile_forward, static_argnums=(5,))


# ---------------------------- main -------------------------------------------
if __name__ == "__main__":
    key = jax.random.PRNGKey(0)
    k_param, k_x0, k_x1, k_ei, k_ea0, k_ea1 = jax.random.split(key, 6)

    params = init_params(k_param)

    N, E, G = 16, 24, 2          # nodes, edges, graphs
    x = jnp.stack([
        jax.random.randint(k_x0, (N,), 0, NUM_ATOM_TYPE, jnp.int32),
        jax.random.randint(k_x1, (N,), 0, NUM_CHIRALITY_TAG, jnp.int32),
    ], axis=1)
    edge_index = jax.random.randint(k_ei, (2, E), 0, N, jnp.int32)
    edge_attr = jnp.stack([
        jax.random.randint(k_ea0, (E,), 0, NUM_BOND_TYPE - 1, jnp.int32),  # 4 reserved for self-loops
        jax.random.randint(k_ea1, (E,), 0, NUM_BOND_DIRECTION, jnp.int32),
    ], axis=1)
    batch = jnp.concatenate([jnp.zeros((N // 2,), jnp.int32),
                             jnp.ones((N - N // 2,), jnp.int32)])

    h_out, pred = agile_forward_jit(params, x, edge_index, edge_attr, batch, G)
    jax.block_until_ready((h_out, pred))

    assert h_out.shape == (G, FEAT_DIM) and pred.shape == (G, OUT_DIM)
    assert jnp.all(jnp.isfinite(h_out)) and jnp.all(jnp.isfinite(pred))
    print("KERNEL_OK")
</pallas_src>

<mosaic_0001>
module attributes {stable_mosaic.version = 11 : i64} {
  func.func @agile_fused_kernel(%arg0: i32, %arg1: memref<16x16xbf16, #tpu.memory_space<vmem>>, %arg2: memref<16x16xbf16, #tpu.memory_space<vmem>>, %arg3: memref<16x1xf32, #tpu.memory_space<vmem>>, %arg4: memref<8x16xf32, #tpu.memory_space<vmem>>, %arg5: memref<8x1xf32, #tpu.memory_space<vmem>>, %arg6: memref<16x128xf32, #tpu.memory_space<vmem>>, %arg7: memref<5x16x128xbf16, #tpu.memory_space<vmem>>, %arg8: memref<5x128x128xbf16, #tpu.memory_space<vmem>>, %arg9: memref<5x128x128xbf16, #tpu.memory_space<vmem>>, %arg10: memref<5x4x128xf32, #tpu.memory_space<vmem>>, %arg11: memref<4x128x128xbf16, #tpu.memory_space<vmem>>, %arg12: memref<4x128xf32, #tpu.memory_space<vmem>>, %arg13: memref<8x128xf32, #tpu.memory_space<vmem>>, %arg14: memref<8x128xf32, #tpu.memory_space<vmem>>) attributes {dimension_semantics = [#tpu.dimension_semantics<arbitrary>], iteration_bounds = array<i64: 1>, scalar_prefetch = 0 : i64, scratch_operands = 0 : i64, tpu.core_type = #tpu.core_type<tc>, window_params = [{pipeline_mode = #tpu.pipeline_mode<synchronous>, transform_indices = @transform_0, window_bounds = array<i64: 16, 16>}, {pipeline_mode = #tpu.pipeline_mode<synchronous>, transform_indices = @transform_1, window_bounds = array<i64: 16, 16>}, {pipeline_mode = #tpu.pipeline_mode<synchronous>, transform_indices = @transform_2, window_bounds = array<i64: 16, 1>}, {pipeline_mode = #tpu.pipeline_mode<synchronous>, transform_indices = @transform_3, window_bounds = array<i64: 8, 16>}, {pipeline_mode = #tpu.pipeline_mode<synchronous>, transform_indices = @transform_4, window_bounds = array<i64: 8, 1>}, {pipeline_mode = #tpu.pipeline_mode<synchronous>, transform_indices = @transform_5, window_bounds = array<i64: 16, 128>}, {pipeline_mode = #tpu.pipeline_mode<synchronous>, transform_indices = @transform_6, window_bounds = array<i64: 5, 16, 128>}, {pipeline_mode = #tpu.pipeline_mode<synchronous>, transform_indices = @transform_7, window_bounds = array<i64: 5, 128, 128>}, {pipeline_mode = #tpu.pipeline_mode<synchronous>, transform_indices = @transform_8, window_bounds = array<i64: 5, 128, 128>}, {pipeline_mode = #tpu.pipeline_mode<synchronous>, transform_indices = @transform_9, window_bounds = array<i64: 5, 4, 128>}, {pipeline_mode = #tpu.pipeline_mode<synchronous>, transform_indices = @transform_10, window_bounds = array<i64: 4, 128, 128>}, {pipeline_mode = #tpu.pipeline_mode<synchronous>, transform_indices = @transform_11, window_bounds = array<i64: 4, 128>}, {pipeline_mode = #tpu.pipeline_mode<synchronous>, transform_indices = @transform_12, window_bounds = array<i64: 8, 128>}, {pipeline_mode = #tpu.pipeline_mode<synchronous>, transform_indices = @transform_13, window_bounds = array<i64: 8, 128>}]} {
    %c0 = arith.constant 0 : index
    %c0_0 = arith.constant 0 : index
    %0 = vector.load %arg1[%c0, %c0_0] : memref<16x16xbf16, #tpu.memory_space<vmem>>, vector<16x16xbf16>
    %c0_1 = arith.constant 0 : index
    %c0_2 = arith.constant 0 : index
    %1 = vector.load %arg2[%c0_1, %c0_2] : memref<16x16xbf16, #tpu.memory_space<vmem>>, vector<16x16xbf16>
    %c0_3 = arith.constant 0 : index
    %c0_4 = arith.constant 0 : index
    %2 = vector.load %arg3[%c0_3, %c0_4] : memref<16x1xf32, #tpu.memory_space<vmem>>, vector<16x1xf32>
    %c0_5 = arith.constant 0 : index
    %c0_6 = arith.constant 0 : index
    %3 = vector.load %arg6[%c0_5, %c0_6] : memref<16x128xf32, #tpu.memory_space<vmem>>, vector<16x128xf32>
    %c0_7 = arith.constant 0 : index
    %c0_8 = arith.constant 0 : index
    %c0_9 = arith.constant 0 : index
    %4 = vector.load %arg10[%c0_7, %c0_8, %c0_9] : memref<5x4x128xf32, #tpu.memory_space<vmem>>, vector<1x4x128xf32>
    %5 = vector.shape_cast %4 : vector<1x4x128xf32> to vector<4x128xf32>
    %6 = arith.truncf %3 : vector<16x128xf32> to vector<16x128xbf16>
    %cst = arith.constant dense<0.000000e+00> : vector<16x128xf32>
    %7 = tpu.matmul %0, %6, %cst {dimension_numbers = #tpu.dot_dimension_numbers<[1], [0], [0], [1], [0, 0, 1, 1], [], []>} : vector<16x16xbf16>, vector<16x128xbf16>, vector<16x128xf32> -> vector<16x128xf32>
    %c0_10 = arith.constant 0 : index
    %c0_11 = arith.constant 0 : index
    %c0_12 = arith.constant 0 : index
    %8 = vector.load %arg7[%c0_10, %c0_11, %c0_12] : memref<5x16x128xbf16, #tpu.memory_space<vmem>>, vector<1x16x128xbf16>
    %9 = vector.shape_cast %8 : vector<1x16x128xbf16> to vector<16x128xbf16>
    %cst_13 = arith.constant dense<0.000000e+00> : vector<16x128xf32>
    %10 = tpu.matmul %1, %9, %cst_13 {dimension_numbers = #tpu.dot_dimension_numbers<[1], [0], [0], [1], [0, 0, 1, 1], [], []>} : vector<16x16xbf16>, vector<16x128xbf16>, vector<16x128xf32> -> vector<16x128xf32>
    %11 = arith.addf %7, %10 : vector<16x128xf32>
    %12 = arith.truncf %11 : vector<16x128xf32> to vector<16x128xbf16>
    %c0_14 = arith.constant 0 : index
    %c0_15 = arith.constant 0 : index
    %c0_16 = arith.constant 0 : index
    %13 = vector.load %arg8[%c0_14, %c0_15, %c0_16] : memref<5x128x128xbf16, #tpu.memory_space<vmem>>, vector<1x128x128xbf16>
    %14 = vector.shape_cast %13 : vector<1x128x128xbf16> to vector<128x128xbf16>
    %cst_17 = arith.constant dense<0.000000e+00> : vector<16x128xf32>
    %15 = tpu.matmul %12, %14, %cst_17 {dimension_numbers = #tpu.dot_dimension_numbers<[1], [0], [0], [1], [0, 0, 1, 1], [], []>} : vector<16x128xbf16>, vector<128x128xbf16>, vector<16x128xf32> -> vector<16x128xf32>
    %16 = vector.extract_strided_slice %5 {offsets = [0, 0], sizes = [1, 128], strides = [1, 1]} : vector<4x128xf32> to vector<1x128xf32>
    %17 = vector.broadcast %16 : vector<1x128xf32> to vector<16x128xf32>
    %18 = arith.addf %15, %17 : vector<16x128xf32>
    %cst_18 = arith.constant 0.000000e+00 : f32
    %19 = vector.broadcast %cst_18 : f32 to vector<16x128xf32>
    %20 = arith.maximumf %18, %19 : vector<16x128xf32>
    %21 = arith.truncf %20 : vector<16x128xf32> to vector<16x128xbf16>
    %c0_19 = arith.constant 0 : index
    %c0_20 = arith.constant 0 : index
    %c0_21 = arith.constant 0 : index
    %22 = vector.load %arg9[%c0_19, %c0_20, %c0_21] : memref<5x128x128xbf16, #tpu.memory_space<vmem>>, vector<1x128x128xbf16>
    %23 = vector.shape_cast %22 : vector<1x128x128xbf16> to vector<128x128xbf16>
    %cst_22 = arith.constant dense<0.000000e+00> : vector<16x128xf32>
    %24 = tpu.matmul %21, %23, %cst_22 {dimension_numbers = #tpu.dot_dimension_numbers<[1], [0], [0], [1], [0, 0, 1, 1], [], []>} : vector<16x128xbf16>, vector<128x128xbf16>, vector<16x128xf32> -> vector<16x128xf32>
    %25 = vector.extract_strided_slice %5 {offsets = [1, 0], sizes = [1, 128], strides = [1, 1]} : vector<4x128xf32> to vector<1x128xf32>
    %26 = vector.broadcast %25 : vector<1x128xf32> to vector<16x128xf32>
    %27 = arith.addf %24, %26 : vector<16x128xf32>
    %28 = vector.broadcast %2 : vector<16x1xf32> to vector<16x128xf32>
    %29 = arith.mulf %27, %28 : vector<16x128xf32>
    %cst_23 = arith.constant dense<0.000000e+00> : vector<128xf32>
    %30 = vector.multi_reduction <add>, %29, %cst_23 [0] : vector<16x128xf32> to vector<128xf32>
    %31 = vector.shape_cast %30 : vector<128xf32> to vector<1x128xf32>
    %cst_24 = arith.constant 6.250000e-02 : f32
    %32 = vector.broadcast %cst_24 : f32 to vector<1x128xf32>
    %33 = arith.mulf %31, %32 : vector<1x128xf32>
    %34 = vector.broadcast %33 : vector<1x128xf32> to vector<16x128xf32>
    %35 = arith.subf %27, %34 : vector<16x128xf32>
    %36 = arith.mulf %35, %35 : vector<16x128xf32>
    %37 = vector.broadcast %2 : vector<16x1xf32> to vector<16x128xf32>
    %38 = arith.mulf %36, %37 : vector<16x128xf32>
    %cst_25 = arith.constant dense<0.000000e+00> : vector<128xf32>
    %39 = vector.multi_reduction <add>, %38, %cst_25 [0] : vector<16x128xf32> to vector<128xf32>
    %40 = vector.shape_cast %39 : vector<128xf32> to vector<1x128xf32>
    %cst_26 = arith.constant 6.250000e-02 : f32
    %41 = vector.broadcast %cst_26 : f32 to vector<1x128xf32>
    %42 = arith.mulf %40, %41 : vector<1x128xf32>
    %cst_27 = arith.constant 9.99999974E-6 : f32
    %43 = vector.broadcast %cst_27 : f32 to vector<1x128xf32>
    %44 = arith.addf %42, %43 : vector<1x128xf32>
    %45 = math.rsqrt %44 : vector<1x128xf32>
    %46 = vector.broadcast %45 : vector<1x128xf32> to vector<16x128xf32>
    %47 = arith.mulf %35, %46 : vector<16x128xf32>
    %48 = vector.extract_strided_slice %5 {offsets = [2, 0], sizes = [1, 128], strides = [1, 1]} : vector<4x128xf32> to vector<1x128xf32>
    %49 = vector.broadcast %48 : vector<1x128xf32> to vector<16x128xf32>
    %50 = arith.mulf %47, %49 : vector<16x128xf32>
    %51 = vector.extract_strided_slice %5 {offsets = [3, 0], sizes = [1, 128], strides = [1, 1]} : vector<4x128xf32> to vector<1x128xf32>
    %52 = vector.broadcast %51 : vector<1x128xf32> to vector<16x128xf32>
    %53 = arith.addf %50, %52 : vector<16x128xf32>
    %cst_28 = arith.constant 0.000000e+00 : f32
    %54 = vector.broadcast %cst_28 : f32 to vector<16x128xf32>
    %55 = arith.maximumf %53, %54 : vector<16x128xf32>
    %c1 = arith.constant 1 : index
    %c0_29 = arith.constant 0 : index
    %c0_30 = arith.constant 0 : index
    %56 = vector.load %arg10[%c1, %c0_29, %c0_30] : memref<5x4x128xf32, #tpu.memory_space<vmem>>, vector<1x4x128xf32>
    %57 = vector.shape_cast %56 : vector<1x4x128xf32> to vector<4x128xf32>
    %58 = arith.truncf %55 : vector<16x128xf32> to vector<16x128xbf16>
    %cst_31 = arith.constant dense<0.000000e+00> : vector<16x128xf32>
    %59 = tpu.matmul %0, %58, %cst_31 {dimension_numbers = #tpu.dot_dimension_numbers<[1], [0], [0], [1], [0, 0, 1, 1], [], []>} : vector<16x16xbf16>, vector<16x128xbf16>, vector<16x128xf32> -> vector<16x128xf32>
    %c1_32 = arith.constant 1 : index
    %c0_33 = arith.constant 0 : index
    %c0_34 = arith.constant 0 : index
    %60 = vector.load %arg7[%c1_32, %c0_33, %c0_34] : memref<5x16x128xbf16, #tpu.memory_space<vmem>>, vector<1x16x128xbf16>
    %61 = vector.shape_cast %60 : vector<1x16x128xbf16> to vector<16x128xbf16>
    %cst_35 = arith.constant dense<0.000000e+00> : vector<16x128xf32>
    %62 = tpu.matmul %1, %61, %cst_35 {dimension_numbers = #tpu.dot_dimension_numbers<[1], [0], [0], [1], [0, 0, 1, 1], [], []>} : vector<16x16xbf16>, vector<16x128xbf16>, vector<16x128xf32> -> vector<16x128xf32>
    %63 = arith.addf %59, %62 : vector<16x128xf32>
    %64 = arith.truncf %63 : vector<16x128xf32> to vector<16x128xbf16>
    %c1_36 = arith.constant 1 : index
    %c0_37 = arith.constant 0 : index
    %c0_38 = arith.constant 0 : index
    %65 = vector.load %arg8[%c1_36, %c0_37, %c0_38] : memref<5x128x128xbf16, #tpu.memory_space<vmem>>, vector<1x128x128xbf16>
    %66 = vector.shape_cast %65 : vector<1x128x128xbf16> to vector<128x128xbf16>
    %cst_39 = arith.constant dense<0.000000e+00> : vector<16x128xf32>
    %67 = tpu.matmul %64, %66, %cst_39 {dimension_numbers = #tpu.dot_dimension_numbers<[1], [0], [0], [1], [0, 0, 1, 1], [], []>} : vector<16x128xbf16>, vector<128x128xbf16>, vector<16x128xf32> -> vector<16x128xf32>
    %68 = vector.extract_strided_slice %57 {offsets = [0, 0], sizes = [1, 128], strides = [1, 1]} : vector<4x128xf32> to vector<1x128xf32>
    %69 = vector.broadcast %68 : vector<1x128xf32> to vector<16x128xf32>
    %70 = arith.addf %67, %69 : vector<16x128xf32>
    %cst_40 = arith.constant 0.000000e+00 : f32
    %71 = vector.broadcast %cst_40 : f32 to vector<16x128xf32>
    %72 = arith.maximumf %70, %71 : vector<16x128xf32>
    %73 = arith.truncf %72 : vector<16x128xf32> to vector<16x128xbf16>
    %c1_41 = arith.constant 1 : index
    %c0_42 = arith.constant 0 : index
    %c0_43 = arith.constant 0 : index
    %74 = vector.load %arg9[%c1_41, %c0_42, %c0_43] : memref<5x128x128xbf16, #tpu.memory_space<vmem>>, vector<1x128x128xbf16>
    %75 = vector.shape_cast %74 : vector<1x128x128xbf16> to vector<128x128xbf16>
    %cst_44 = arith.constant dense<0.000000e+00> : vector<16x128xf32>
    %76 = tpu.matmul %73, %75, %cst_44 {dimension_numbers = #tpu.dot_dimension_numbers<[1], [0], [0], [1], [0, 0, 1, 1], [], []>} : vector<16x128xbf16>, vector<128x128xbf16>, vector<16x128xf32> -> vector<16x128xf32>
    %77 = vector.extract_strided_slice %57 {offsets = [1, 0], sizes = [1, 128], strides = [1, 1]} : vector<4x128xf32> to vector<1x128xf32>
    %78 = vector.broadcast %77 : vector<1x128xf32> to vector<16x128xf32>
    %79 = arith.addf %76, %78 : vector<16x128xf32>
    %80 = vector.broadcast %2 : vector<16x1xf32> to vector<16x128xf32>
    %81 = arith.mulf %79, %80 : vector<16x128xf32>
    %cst_45 = arith.constant dense<0.000000e+00> : vector<128xf32>
    %82 = vector.multi_reduction <add>, %81, %cst_45 [0] : vector<16x128xf32> to vector<128xf32>
    %83 = vector.shape_cast %82 : vector<128xf32> to vector<1x128xf32>
    %cst_46 = arith.constant 6.250000e-02 : f32
    %84 = vector.broadcast %cst_46 : f32 to vector<1x128xf32>
    %85 = arith.mulf %83, %84 : vector<1x128xf32>
    %86 = vector.broadcast %85 : vector<1x128xf32> to vector<16x128xf32>
    %87 = arith.subf %79, %86 : vector<16x128xf32>
    %88 = arith.mulf %87, %87 : vector<16x128xf32>
    %89 = vector.broadcast %2 : vector<16x1xf32> to vector<16x128xf32>
    %90 = arith.mulf %88, %89 : vector<16x128xf32>
    %cst_47 = arith.constant dense<0.000000e+00> : vector<128xf32>
    %91 = vector.multi_reduction <add>, %90, %cst_47 [0] : vector<16x128xf32> to vector<128xf32>
    %92 = vector.shape_cast %91 : vector<128xf32> to vector<1x128xf32>
    %cst_48 = arith.constant 6.250000e-02 : f32
    %93 = vector.broadcast %cst_48 : f32 to vector<1x128xf32>
    %94 = arith.mulf %92, %93 : vector<1x128xf32>
    %cst_49 = arith.constant 9.99999974E-6 : f32
    %95 = vector.broadcast %cst_49 : f32 to vector<1x128xf32>
    %96 = arith.addf %94, %95 : vector<1x128xf32>
    %97 = math.rsqrt %96 : vector<1x128xf32>
    %98 = vector.broadcast %97 : vector<1x128xf32> to vector<16x128xf32>
    %99 = arith.mulf %87, %98 : vector<16x128xf32>
    %100 = vector.extract_strided_slice %57 {offsets = [2, 0], sizes = [1, 128], strides = [1, 1]} : vector<4x128xf32> to vector<1x128xf32>
    %101 = vector.broadcast %100 : vector<1x128xf32> to vector<16x128xf32>
    %102 = arith.mulf %99, %101 : vector<16x128xf32>
    %103 = vector.extract_strided_slice %57 {offsets = [3, 0], sizes = [1, 128], strides = [1, 1]} : vector<4x128xf32> to vector<1x128xf32>
    %104 = vector.broadcast %103 : vector<1x128xf32> to vector<16x128xf32>
    %105 = arith.addf %102, %104 : vector<16x128xf32>
    %cst_50 = arith.constant 0.000000e+00 : f32
    %106 = vector.broadcast %cst_50 : f32 to vector<16x128xf32>
    %107 = arith.maximumf %105, %106 : vector<16x128xf32>
    %c2 = arith.constant 2 : index
    %c0_51 = arith.constant 0 : index
    %c0_52 = arith.constant 0 : index
    %108 = vector.load %arg10[%c2, %c0_51, %c0_52] : memref<5x4x128xf32, #tpu.memory_space<vmem>>, vector<1x4x128xf32>
    %109 = vector.shape_cast %108 : vector<1x4x128xf32> to vector<4x128xf32>
    %110 = arith.truncf %107 : vector<16x128xf32> to vector<16x128xbf16>
    %cst_53 = arith.constant dense<0.000000e+00> : vector<16x128xf32>
    %111 = tpu.matmul %0, %110, %cst_53 {dimension_numbers = #tpu.dot_dimension_numbers<[1], [0], [0], [1], [0, 0, 1, 1], [], []>} : vector<16x16xbf16>, vector<16x128xbf16>, vector<16x128xf32> -> vector<16x128xf32>
    %c2_54 = arith.constant 2 : index
    %c0_55 = arith.constant 0 : index
    %c0_56 = arith.constant 0 : index
    %112 = vector.load %arg7[%c2_54, %c0_55, %c0_56] : memref<5x16x128xbf16, #tpu.memory_space<vmem>>, vector<1x16x128xbf16>
    %113 = vector.shape_cast %112 : vector<1x16x128xbf16> to vector<16x128xbf16>
    %cst_57 = arith.constant dense<0.000000e+00> : vector<16x128xf32>
    %114 = tpu.matmul %1, %113, %cst_57 {dimension_numbers = #tpu.dot_dimension_numbers<[1], [0], [0], [1], [0, 0, 1, 1], [], []>} : vector<16x16xbf16>, vector<16x128xbf16>, vector<16x128xf32> -> vector<16x128xf32>
    %115 = arith.addf %111, %114 : vector<16x128xf32>
    %116 = arith.truncf %115 : vector<16x128xf32> to vector<16x128xbf16>
    %c2_58 = arith.constant 2 : index
    %c0_59 = arith.constant 0 : index
    %c0_60 = arith.constant 0 : index
    %117 = vector.load %arg8[%c2_58, %c0_59, %c0_60] : memref<5x128x128xbf16, #tpu.memory_space<vmem>>, vector<1x128x128xbf16>
    %118 = vector.shape_cast %117 : vector<1x128x128xbf16> to vector<128x128xbf16>
    %cst_61 = arith.constant dense<0.000000e+00> : vector<16x128xf32>
    %119 = tpu.matmul %116, %118, %cst_61 {dimension_numbers = #tpu.dot_dimension_numbers<[1], [0], [0], [1], [0, 0, 1, 1], [], []>} : vector<16x128xbf16>, vector<128x128xbf16>, vector<16x128xf32> -> vector<16x128xf32>
    %120 = vector.extract_strided_slice %109 {offsets = [0, 0], sizes = [1, 128], strides = [1, 1]} : vector<4x128xf32> to vector<1x128xf32>
    %121 = vector.broadcast %120 : vector<1x128xf32> to vector<16x128xf32>
    %122 = arith.addf %119, %121 : vector<16x128xf32>
    %cst_62 = arith.constant 0.000000e+00 : f32
    %123 = vector.broadcast %cst_62 : f32 to vector<16x128xf32>
    %124 = arith.maximumf %122, %123 : vector<16x128xf32>
    %125 = arith.truncf %124 : vector<16x128xf32> to vector<16x128xbf16>
    %c2_63 = arith.constant 2 : index
    %c0_64 = arith.constant 0 : index
    %c0_65 = arith.constant 0 : index
    %126 = vector.load %arg9[%c2_63, %c0_64, %c0_65] : memref<5x128x128xbf16, #tpu.memory_space<vmem>>, vector<1x128x128xbf16>
    %127 = vector.shape_cast %126 : vector<1x128x128xbf16> to vector<128x128xbf16>
    %cst_66 = arith.constant dense<0.000000e+00> : vector<16x128xf32>
    %128 = tpu.matmul %125, %127, %cst_66 {dimension_numbers = #tpu.dot_dimension_numbers<[1], [0], [0], [1], [0, 0, 1, 1], [], []>} : vector<16x128xbf16>, vector<128x128xbf16>, vector<16x128xf32> -> vector<16x128xf32>
    %129 = vector.extract_strided_slice %109 {offsets = [1, 0], sizes = [1, 128], strides = [1, 1]} : vector<4x128xf32> to vector<1x128xf32>
    %130 = vector.broadcast %129 : vector<1x128xf32> to vector<16x128xf32>
    %131 = arith.addf %128, %130 : vector<16x128xf32>
    %132 = vector.broadcast %2 : vector<16x1xf32> to vector<16x128xf32>
    %133 = arith.mulf %131, %132 : vector<16x128xf32>
    %cst_67 = arith.constant dense<0.000000e+00> : vector<128xf32>
    %134 = vector.multi_reduction <add>, %133, %cst_67 [0] : vector<16x128xf32> to vector<128xf32>
    %135 = vector.shape_cast %134 : vector<128xf32> to vector<1x128xf32>
    %cst_68 = arith.constant 6.250000e-02 : f32
    %136 = vector.broadcast %cst_68 : f32 to vector<1x128xf32>
    %137 = arith.mulf %135, %136 : vector<1x128xf32>
    %138 = vector.broadcast %137 : vector<1x128xf32> to vector<16x128xf32>
    %139 = arith.subf %131, %138 : vector<16x128xf32>
    %140 = arith.mulf %139, %139 : vector<16x128xf32>
    %141 = vector.broadcast %2 : vector<16x1xf32> to vector<16x128xf32>
    %142 = arith.mulf %140, %141 : vector<16x128xf32>
    %cst_69 = arith.constant dense<0.000000e+00> : vector<128xf32>
    %143 = vector.multi_reduction <add>, %142, %cst_69 [0] : vector<16x128xf32> to vector<128xf32>
    %144 = vector.shape_cast %143 : vector<128xf32> to vector<1x128xf32>
    %cst_70 = arith.constant 6.250000e-02 : f32
    %145 = vector.broadcast %cst_70 : f32 to vector<1x128xf32>
    %146 = arith.mulf %144, %145 : vector<1x128xf32>
    %cst_71 = arith.constant 9.99999974E-6 : f32
    %147 = vector.broadcast %cst_71 : f32 to vector<1x128xf32>
    %148 = arith.addf %146, %147 : vector<1x128xf32>
    %149 = math.rsqrt %148 : vector<1x128xf32>
    %150 = vector.broadcast %149 : vector<1x128xf32> to vector<16x128xf32>
    %151 = arith.mulf %139, %150 : vector<16x128xf32>
    %152 = vector.extract_strided_slice %109 {offsets = [2, 0], sizes = [1, 128], strides = [1, 1]} : vector<4x128xf32> to vector<1x128xf32>
    %153 = vector.broadcast %152 : vector<1x128xf32> to vector<16x128xf32>
    %154 = arith.mulf %151, %153 : vector<16x128xf32>
    %155 = vector.extract_strided_slice %109 {offsets = [3, 0], sizes = [1, 128], strides = [1, 1]} : vector<4x128xf32> to vector<1x128xf32>
    %156 = vector.broadcast %155 : vector<1x128xf32> to vector<16x128xf32>
    %157 = arith.addf %154, %156 : vector<16x128xf32>
    %cst_72 = arith.constant 0.000000e+00 : f32
    %158 = vector.broadcast %cst_72 : f32 to vector<16x128xf32>
    %159 = arith.maximumf %157, %158 : vector<16x128xf32>
    %c3 = arith.constant 3 : index
    %c0_73 = arith.constant 0 : index
    %c0_74 = arith.constant 0 : index
    %160 = vector.load %arg10[%c3, %c0_73, %c0_74] : memref<5x4x128xf32, #tpu.memory_space<vmem>>, vector<1x4x128xf32>
    %161 = vector.shape_cast %160 : vector<1x4x128xf32> to vector<4x128xf32>
    %162 = arith.truncf %159 : vector<16x128xf32> to vector<16x128xbf16>
    %cst_75 = arith.constant dense<0.000000e+00> : vector<16x128xf32>
    %163 = tpu.matmul %0, %162, %cst_75 {dimension_numbers = #tpu.dot_dimension_numbers<[1], [0], [0], [1], [0, 0, 1, 1], [], []>} : vector<16x16xbf16>, vector<16x128xbf16>, vector<16x128xf32> -> vector<16x128xf32>
    %c3_76 = arith.constant 3 : index
    %c0_77 = arith.constant 0 : index
    %c0_78 = arith.constant 0 : index
    %164 = vector.load %arg7[%c3_76, %c0_77, %c0_78] : memref<5x16x128xbf16, #tpu.memory_space<vmem>>, vector<1x16x128xbf16>
    %165 = vector.shape_cast %164 : vector<1x16x128xbf16> to vector<16x128xbf16>
    %cst_79 = arith.constant dense<0.000000e+00> : vector<16x128xf32>
    %166 = tpu.matmul %1, %165, %cst_79 {dimension_numbers = #tpu.dot_dimension_numbers<[1], [0], [0], [1], [0, 0, 1, 1], [], []>} : vector<16x16xbf16>, vector<16x128xbf16>, vector<16x128xf32> -> vector<16x128xf32>
    %167 = arith.addf %163, %166 : vector<16x128xf32>
    %168 = arith.truncf %167 : vector<16x128xf32> to vector<16x128xbf16>
    %c3_80 = arith.constant 3 : index
    %c0_81 = arith.constant 0 : index
    %c0_82 = arith.constant 0 : index
    %169 = vector.load %arg8[%c3_80, %c0_81, %c0_82] : memref<5x128x128xbf16, #tpu.memory_space<vmem>>, vector<1x128x128xbf16>
    %170 = vector.shape_cast %169 : vector<1x128x128xbf16> to vector<128x128xbf16>
    %cst_83 = arith.constant dense<0.000000e+00> : vector<16x128xf32>
    %171 = tpu.matmul %168, %170, %cst_83 {dimension_numbers = #tpu.dot_dimension_numbers<[1], [0], [0], [1], [0, 0, 1, 1], [], []>} : vector<16x128xbf16>, vector<128x128xbf16>, vector<16x128xf32> -> vector<16x128xf32>
    %172 = vector.extract_strided_slice %161 {offsets = [0, 0], sizes = [1, 128], strides = [1, 1]} : vector<4x128xf32> to vector<1x128xf32>
    %173 = vector.broadcast %172 : vector<1x128xf32> to vector<16x128xf32>
    %174 = arith.addf %171, %173 : vector<16x128xf32>
    %cst_84 = arith.constant 0.000000e+00 : f32
    %175 = vector.broadcast %cst_84 : f32 to vector<16x128xf32>
    %176 = arith.maximumf %174, %175 : vector<16x128xf32>
    %177 = arith.truncf %176 : vector<16x128xf32> to vector<16x128xbf16>
    %c3_85 = arith.constant 3 : index
    %c0_86 = arith.constant 0 : index
    %c0_87 = arith.constant 0 : index
    %178 = vector.load %arg9[%c3_85, %c0_86, %c0_87] : memref<5x128x128xbf16, #tpu.memory_space<vmem>>, vector<1x128x128xbf16>
    %179 = vector.shape_cast %178 : vector<1x128x128xbf16> to vector<128x128xbf16>
    %cst_88 = arith.constant dense<0.000000e+00> : vector<16x128xf32>
    %180 = tpu.matmul %177, %179, %cst_88 {dimension_numbers = #tpu.dot_dimension_numbers<[1], [0], [0], [1], [0, 0, 1, 1], [], []>} : vector<16x128xbf16>, vector<128x128xbf16>, vector<16x128xf32> -> vector<16x128xf32>
    %181 = vector.extract_strided_slice %161 {offsets = [1, 0], sizes = [1, 128], strides = [1, 1]} : vector<4x128xf32> to vector<1x128xf32>
    %182 = vector.broadcast %181 : vector<1x128xf32> to vector<16x128xf32>
    %183 = arith.addf %180, %182 : vector<16x128xf32>
    %184 = vector.broadcast %2 : vector<16x1xf32> to vector<16x128xf32>
    %185 = arith.mulf %183, %184 : vector<16x128xf32>
    %cst_89 = arith.constant dense<0.000000e+00> : vector<128xf32>
    %186 = vector.multi_reduction <add>, %185, %cst_89 [0] : vector<16x128xf32> to vector<128xf32>
    %187 = vector.shape_cast %186 : vector<128xf32> to vector<1x128xf32>
    %cst_90 = arith.constant 6.250000e-02 : f32
    %188 = vector.broadcast %cst_90 : f32 to vector<1x128xf32>
    %189 = arith.mulf %187, %188 : vector<1x128xf32>
    %190 = vector.broadcast %189 : vector<1x128xf32> to vector<16x128xf32>
    %191 = arith.subf %183, %190 : vector<16x128xf32>
    %192 = arith.mulf %191, %191 : vector<16x128xf32>
    %193 = vector.broadcast %2 : vector<16x1xf32> to vector<16x128xf32>
    %194 = arith.mulf %192, %193 : vector<16x128xf32>
    %cst_91 = arith.constant dense<0.000000e+00> : vector<128xf32>
    %195 = vector.multi_reduction <add>, %194, %cst_91 [0] : vector<16x128xf32> to vector<128xf32>
    %196 = vector.shape_cast %195 : vector<128xf32> to vector<1x128xf32>
    %cst_92 = arith.constant 6.250000e-02 : f32
    %197 = vector.broadcast %cst_92 : f32 to vector<1x128xf32>
    %198 = arith.mulf %196, %197 : vector<1x128xf32>
    %cst_93 = arith.constant 9.99999974E-6 : f32
    %199 = vector.broadcast %cst_93 : f32 to vector<1x128xf32>
    %200 = arith.addf %198, %199 : vector<1x128xf32>
    %201 = math.rsqrt %200 : vector<1x128xf32>
    %202 = vector.broadcast %201 : vector<1x128xf32> to vector<16x128xf32>
    %203 = arith.mulf %191, %202 : vector<16x128xf32>
    %204 = vector.extract_strided_slice %161 {offsets = [2, 0], sizes = [1, 128], strides = [1, 1]} : vector<4x128xf32> to vector<1x128xf32>
    %205 = vector.broadcast %204 : vector<1x128xf32> to vector<16x128xf32>
    %206 = arith.mulf %203, %205 : vector<16x128xf32>
    %207 = vector.extract_strided_slice %161 {offsets = [3, 0], sizes = [1, 128], strides = [1, 1]} : vector<4x128xf32> to vector<1x128xf32>
    %208 = vector.broadcast %207 : vector<1x128xf32> to vector<16x128xf32>
    %209 = arith.addf %206, %208 : vector<16x128xf32>
    %cst_94 = arith.constant 0.000000e+00 : f32
    %210 = vector.broadcast %cst_94 : f32 to vector<16x128xf32>
    %211 = arith.maximumf %209, %210 : vector<16x128xf32>
    %c4 = arith.constant 4 : index
    %c0_95 = arith.constant 0 : index
    %c0_96 = arith.constant 0 : index
    %212 = vector.load %arg10[%c4, %c0_95, %c0_96] : memref<5x4x128xf32, #tpu.memory_space<vmem>>, vector<1x4x128xf32>
    %213 = vector.shape_cast %212 : vector<1x4x128xf32> to vector<4x128xf32>
    %214 = arith.truncf %211 : vector<16x128xf32> to vector<16x128xbf16>
    %cst_97 = arith.constant dense<0.000000e+00> : vector<16x128xf32>
    %215 = tpu.matmul %0, %214, %cst_97 {dimension_numbers = #tpu.dot_dimension_numbers<[1], [0], [0], [1], [0, 0, 1, 1], [], []>} : vector<16x16xbf16>, vector<16x128xbf16>, vector<16x128xf32> -> vector<16x128xf32>
    %c4_98 = arith.constant 4 : index
    %c0_99 = arith.constant 0 : index
    %c0_100 = arith.constant 0 : index
    %216 = vector.load %arg7[%c4_98, %c0_99, %c0_100] : memref<5x16x128xbf16, #tpu.memory_space<vmem>>, vector<1x16x128xbf16>
    %217 = vector.shape_cast %216 : vector<1x16x128xbf16> to vector<16x128xbf16>
    %cst_101 = arith.constant dense<0.000000e+00> : vector<16x128xf32>
    %218 = tpu.matmul %1, %217, %cst_101 {dimension_numbers = #tpu.dot_dimension_numbers<[1], [0], [0], [1], [0, 0, 1, 1], [], []>} : vector<16x16xbf16>, vector<16x128xbf16>, vector<16x128xf32> -> vector<16x128xf32>
    %219 = arith.addf %215, %218 : vector<16x128xf32>
    %220 = arith.truncf %219 : vector<16x128xf32> to vector<16x128xbf16>
    %c4_102 = arith.constant 4 : index
    %c0_103 = arith.constant 0 : index
    %c0_104 = arith.constant 0 : index
    %221 = vector.load %arg8[%c4_102, %c0_103, %c0_104] : memref<5x128x128xbf16, #tpu.memory_space<vmem>>, vector<1x128x128xbf16>
    %222 = vector.shape_cast %221 : vector<1x128x128xbf16> to vector<128x128xbf16>
    %cst_105 = arith.constant dense<0.000000e+00> : vector<16x128xf32>
    %223 = tpu.matmul %220, %222, %cst_105 {dimension_numbers = #tpu.dot_dimension_numbers<[1], [0], [0], [1], [0, 0, 1, 1], [], []>} : vector<16x128xbf16>, vector<128x128xbf16>, vector<16x128xf32> -> vector<16x128xf32>
    %224 = vector.extract_strided_slice %213 {offsets = [0, 0], sizes = [1, 128], strides = [1, 1]} : vector<4x128xf32> to vector<1x128xf32>
    %225 = vector.broadcast %224 : vector<1x128xf32> to vector<16x128xf32>
    %226 = arith.addf %223, %225 : vector<16x128xf32>
    %cst_106 = arith.constant 0.000000e+00 : f32
    %227 = vector.broadcast %cst_106 : f32 to vector<16x128xf32>
    %228 = arith.maximumf %226, %227 : vector<16x128xf32>
    %229 = arith.truncf %228 : vector<16x128xf32> to vector<16x128xbf16>
    %c4_107 = arith.constant 4 : index
    %c0_108 = arith.constant 0 : index
    %c0_109 = arith.constant 0 : index
    %230 = vector.load %arg9[%c4_107, %c0_108, %c0_109] : memref<5x128x128xbf16, #tpu.memory_space<vmem>>, vector<1x128x128xbf16>
    %231 = vector.shape_cast %230 : vector<1x128x128xbf16> to vector<128x128xbf16>
    %cst_110 = arith.constant dense<0.000000e+00> : vector<16x128xf32>
    %232 = tpu.matmul %229, %231, %cst_110 {dimension_numbers = #tpu.dot_dimension_numbers<[1], [0], [0], [1], [0, 0, 1, 1], [], []>} : vector<16x128xbf16>, vector<128x128xbf16>, vector<16x128xf32> -> vector<16x128xf32>
    %233 = vector.extract_strided_slice %213 {offsets = [1, 0], sizes = [1, 128], strides = [1, 1]} : vector<4x128xf32> to vector<1x128xf32>
    %234 = vector.broadcast %233 : vector<1x128xf32> to vector<16x128xf32>
    %235 = arith.addf %232, %234 : vector<16x128xf32>
    %236 = vector.broadcast %2 : vector<16x1xf32> to vector<16x128xf32>
    %237 = arith.mulf %235, %236 : vector<16x128xf32>
    %cst_111 = arith.constant dense<0.000000e+00> : vector<128xf32>
    %238 = vector.multi_reduction <add>, %237, %cst_111 [0] : vector<16x128xf32> to vector<128xf32>
    %239 = vector.shape_cast %238 : vector<128xf32> to vector<1x128xf32>
    %cst_112 = arith.constant 6.250000e-02 : f32
    %240 = vector.broadcast %cst_112 : f32 to vector<1x128xf32>
    %241 = arith.mulf %239, %240 : vector<1x128xf32>
    %242 = vector.broadcast %241 : vector<1x128xf32> to vector<16x128xf32>
    %243 = arith.subf %235, %242 : vector<16x128xf32>
    %244 = arith.mulf %243, %243 : vector<16x128xf32>
    %245 = vector.broadcast %2 : vector<16x1xf32> to vector<16x128xf32>
    %246 = arith.mulf %244, %245 : vector<16x128xf32>
    %cst_113 = arith.constant dense<0.000000e+00> : vector<128xf32>
    %247 = vector.multi_reduction <add>, %246, %cst_113 [0] : vector<16x128xf32> to vector<128xf32>
    %248 = vector.shape_cast %247 : vector<128xf32> to vector<1x128xf32>
    %cst_114 = arith.constant 6.250000e-02 : f32
    %249 = vector.broadcast %cst_114 : f32 to vector<1x128xf32>
    %250 = arith.mulf %248, %249 : vector<1x128xf32>
    %cst_115 = arith.constant 9.99999974E-6 : f32
    %251 = vector.broadcast %cst_115 : f32 to vector<1x128xf32>
    %252 = arith.addf %250, %251 : vector<1x128xf32>
    %253 = math.rsqrt %252 : vector<1x128xf32>
    %254 = vector.broadcast %253 : vector<1x128xf32> to vector<16x128xf32>
    %255 = arith.mulf %243, %254 : vector<16x128xf32>
    %256 = vector.extract_strided_slice %213 {offsets = [2, 0], sizes = [1, 128], strides = [1, 1]} : vector<4x128xf32> to vector<1x128xf32>
    %257 = vector.broadcast %256 : vector<1x128xf32> to vector<16x128xf32>
    %258 = arith.mulf %255, %257 : vector<16x128xf32>
    %259 = vector.extract_strided_slice %213 {offsets = [3, 0], sizes = [1, 128], strides = [1, 1]} : vector<4x128xf32> to vector<1x128xf32>
    %260 = vector.broadcast %259 : vector<1x128xf32> to vector<16x128xf32>
    %261 = arith.addf %258, %260 : vector<16x128xf32>
    %c0_116 = arith.constant 0 : index
    %c0_117 = arith.constant 0 : index
    %262 = vector.load %arg12[%c0_116, %c0_117] : memref<4x128xf32, #tpu.memory_space<vmem>>, vector<4x128xf32>
    %c0_118 = arith.constant 0 : index
    %c0_119 = arith.constant 0 : index
    %263 = vector.load %arg4[%c0_118, %c0_119] : memref<8x16xf32, #tpu.memory_space<vmem>>, vector<8x16xf32>
    %cst_120 = arith.constant dense<0.000000e+00> : vector<8x128xf32>
    %264 = tpu.matmul %263, %261, %cst_120 {dimension_numbers = #tpu.dot_dimension_numbers<[1], [0], [0], [1], [0, 0, 1, 1], [], []>} : vector<8x16xf32>, vector<16x128xf32>, vector<8x128xf32> -> vector<8x128xf32>
    %c0_121 = arith.constant 0 : index
    %c0_122 = arith.constant 0 : index
    %265 = vector.load %arg5[%c0_121, %c0_122] : memref<8x1xf32, #tpu.memory_space<vmem>>, vector<8x1xf32>
    %266 = vector.broadcast %265 : vector<8x1xf32> to vector<8x128xf32>
    %267 = arith.mulf %264, %266 : vector<8x128xf32>
    %268 = arith.truncf %267 : vector<8x128xf32> to vector<8x128xbf16>
    %c0_123 = arith.constant 0 : index
    %c0_124 = arith.constant 0 : index
    %c0_125 = arith.constant 0 : index
    %269 = vector.load %arg11[%c0_123, %c0_124, %c0_125] : memref<4x128x128xbf16, #tpu.memory_space<vmem>>, vector<1x128x128xbf16>
    %270 = vector.shape_cast %269 : vector<1x128x128xbf16> to vector<128x128xbf16>
    %cst_126 = arith.constant dense<0.000000e+00> : vector<8x128xf32>
    %271 = tpu.matmul %268, %270, %cst_126 {dimension_numbers = #tpu.dot_dimension_numbers<[1], [0], [0], [1], [0, 0, 1, 1], [], []>} : vector<8x128xbf16>, vector<128x128xbf16>, vector<8x128xf32> -> vector<8x128xf32>
    %272 = vector.extract_strided_slice %262 {offsets = [0, 0], sizes = [1, 128], strides = [1, 1]} : vector<4x128xf32> to vector<1x128xf32>
    %273 = vector.broadcast %272 : vector<1x128xf32> to vector<8x128xf32>
    %274 = arith.addf %271, %273 : vector<8x128xf32>
    %c0_127 = arith.constant 0 : index
    %c0_128 = arith.constant 0 : index
    %275 = vector.load %arg13[%c0_127, %c0_128] : memref<8x128xf32, #tpu.memory_space<vmem>>, vector<8x128xf32>
    tpu.vector_store %arg13[%c0_127, %c0_128], %274 {strides = array<i32>} : memref<8x128xf32, #tpu.memory_space<vmem>>, vector<8x128xf32>,
    %276 = arith.truncf %274 : vector<8x128xf32> to vector<8x128xbf16>
    %c1_129 = arith.constant 1 : index
    %c0_130 = arith.constant 0 : index
    %c0_131 = arith.constant 0 : index
    %277 = vector.load %arg11[%c1_129, %c0_130, %c0_131] : memref<4x128x128xbf16, #tpu.memory_space<vmem>>, vector<1x128x128xbf16>
    %278 = vector.shape_cast %277 : vector<1x128x128xbf16> to vector<128x128xbf16>
    %cst_132 = arith.constant dense<0.000000e+00> : vector<8x128xf32>
    %279 = tpu.matmul %276, %278, %cst_132 {dimension_numbers = #tpu.dot_dimension_numbers<[1], [0], [0], [1], [0, 0, 1, 1], [], []>} : vector<8x128xbf16>, vector<128x128xbf16>, vector<8x128xf32> -> vector<8x128xf32>
    %280 = vector.extract_strided_slice %262 {offsets = [1, 0], sizes = [1, 128], strides = [1, 1]} : vector<4x128xf32> to vector<1x128xf32>
    %281 = vector.broadcast %280 : vector<1x128xf32> to vector<8x128xf32>
    %282 = arith.addf %279, %281 : vector<8x128xf32>
    %cst_133 = arith.constant 0.000000e+00 : f32
    %283 = vector.broadcast %cst_133 : f32 to vector<8x128xf32>
    %284 = arith.maximumf %282, %283 : vector<8x128xf32>
    %285 = math.absf %282 : vector<8x128xf32>
    %cst_134 = arith.constant 0.000000e+00 : f32
    %286 = vector.broadcast %cst_134 : f32 to vector<8x128xf32>
    %287 = arith.subf %286, %285 : vector<8x128xf32>
    %288 = math.exp %287 : vector<8x128xf32>
    %289 = math.log1p %288 : vector<8x128xf32>
    %290 = arith.addf %284, %289 : vector<8x128xf32>
    %291 = arith.truncf %290 : vector<8x128xf32> to vector<8x128xbf16>
    %c2_135 = arith.constant 2 : index
    %c0_136 = arith.constant 0 : index
    %c0_137 = arith.constant 0 : index
    %292 = vector.load %arg11[%c2_135, %c0_136, %c0_137] : memref<4x128x128xbf16, #tpu.memory_space<vmem>>, vector<1x128x128xbf16>
    %293 = vector.shape_cast %292 : vector<1x128x128xbf16> to vector<128x128xbf16>
    %cst_138 = arith.constant dense<0.000000e+00> : vector<8x128xf32>
    %294 = tpu.matmul %291, %293, %cst_138 {dimension_numbers = #tpu.dot_dimension_numbers<[1], [0], [0], [1], [0, 0, 1, 1], [], []>} : vector<8x128xbf16>, vector<128x128xbf16>, vector<8x128xf32> -> vector<8x128xf32>
    %295 = vector.extract_strided_slice %262 {offsets = [2, 0], sizes = [1, 128], strides = [1, 1]} : vector<4x128xf32> to vector<1x128xf32>
    %296 = vector.broadcast %295 : vector<1x128xf32> to vector<8x128xf32>
    %297 = arith.addf %294, %296 : vector<8x128xf32>
    %cst_139 = arith.constant 0.000000e+00 : f32
    %298 = vector.broadcast %cst_139 : f32 to vector<8x128xf32>
    %299 = arith.maximumf %297, %298 : vector<8x128xf32>
    %300 = math.absf %297 : vector<8x128xf32>
    %cst_140 = arith.constant 0.000000e+00 : f32
    %301 = vector.broadcast %cst_140 : f32 to vector<8x128xf32>
    %302 = arith.subf %301, %300 : vector<8x128xf32>
    %303 = math.exp %302 : vector<8x128xf32>
    %304 = math.log1p %303 : vector<8x128xf32>
    %305 = arith.addf %299, %304 : vector<8x128xf32>
    %306 = arith.truncf %305 : vector<8x128xf32> to vector<8x128xbf16>
    %c3_141 = arith.constant 3 : index
    %c0_142 = arith.constant 0 : index
    %c0_143 = arith.constant 0 : index
    %307 = vector.load %arg11[%c3_141, %c0_142, %c0_143] : memref<4x128x128xbf16, #tpu.memory_space<vmem>>, vector<1x128x128xbf16>
    %308 = vector.shape_cast %307 : vector<1x128x128xbf16> to vector<128x128xbf16>
    %cst_144 = arith.constant dense<0.000000e+00> : vector<8x128xf32>
    %309 = tpu.matmul %306, %308, %cst_144 {dimension_numbers = #tpu.dot_dimension_numbers<[1], [0], [0], [1], [0, 0, 1, 1], [], []>} : vector<8x128xbf16>, vector<128x128xbf16>, vector<8x128xf32> -> vector<8x128xf32>
    %310 = vector.extract_strided_slice %262 {offsets = [3, 0], sizes = [1, 128], strides = [1, 1]} : vector<4x128xf32> to vector<1x128xf32>
    %311 = vector.broadcast %310 : vector<1x128xf32> to vector<8x128xf32>
    %312 = arith.addf %309, %311 : vector<8x128xf32>
    %c0_145 = arith.constant 0 : index
    %c0_146 = arith.constant 0 : index
    %313 = vector.load %arg14[%c0_145, %c0_146] : memref<8x128xf32, #tpu.memory_space<vmem>>, vector<8x128xf32>
    tpu.vector_store %arg14[%c0_145, %c0_146], %312 {strides = array<i32>} : memref<8x128xf32, #tpu.memory_space<vmem>>, vector<8x128xf32>,
    return
  }
  func.func @transform_0(%arg0: i32) -> (i32, i32) {
    %c0_i32 = arith.constant 0 : i32
    %c0_i32_0 = arith.constant 0 : i32
    %c0_i32_1 = arith.constant 0 : i32
    return %c0_i32, %c0_i32_0 : i32, i32
  }
  func.func @transform_1(%arg0: i32) -> (i32, i32) {
    %c0_i32 = arith.constant 0 : i32
    %c0_i32_0 = arith.constant 0 : i32
    %c0_i32_1 = arith.constant 0 : i32
    return %c0_i32, %c0_i32_0 : i32, i32
  }
  func.func @transform_2(%arg0: i32) -> (i32, i32) {
    %c0_i32 = arith.constant 0 : i32
    %c0_i32_0 = arith.constant 0 : i32
    %c0_i32_1 = arith.constant 0 : i32
    return %c0_i32, %c0_i32_0 : i32, i32
  }
  func.func @transform_3(%arg0: i32) -> (i32, i32) {
    %c0_i32 = arith.constant 0 : i32
    %c0_i32_0 = arith.constant 0 : i32
    %c0_i32_1 = arith.constant 0 : i32
    return %c0_i32, %c0_i32_0 : i32, i32
  }
  func.func @transform_4(%arg0: i32) -> (i32, i32) {
    %c0_i32 = arith.constant 0 : i32
    %c0_i32_0 = arith.constant 0 : i32
    %c0_i32_1 = arith.constant 0 : i32
    return %c0_i32, %c0_i32_0 : i32, i32
  }
  func.func @transform_5(%arg0: i32) -> (i32, i32) {
    %c0_i32 = arith.constant 0 : i32
    %c0_i32_0 = arith.constant 0 : i32
    %c0_i32_1 = arith.constant 0 : i32
    return %c0_i32, %c0_i32_0 : i32, i32
  }
  func.func @transform_6(%arg0: i32) -> (i32, i32, i32) {
    %c0_i32 = arith.constant 0 : i32
    %c0_i32_0 = arith.constant 0 : i32
    %c0_i32_1 = arith.constant 0 : i32
    %c0_i32_2 = arith.constant 0 : i32
    return %c0_i32, %c0_i32_0, %c0_i32_1 : i32, i32, i32
  }
  func.func @transform_7(%arg0: i32) -> (i32, i32, i32) {
    %c0_i32 = arith.constant 0 : i32
    %c0_i32_0 = arith.constant 0 : i32
    %c0_i32_1 = arith.constant 0 : i32
    %c0_i32_2 = arith.constant 0 : i32
    return %c0_i32, %c0_i32_0, %c0_i32_1 : i32, i32, i32
  }
  func.func @transform_8(%arg0: i32) -> (i32, i32, i32) {
    %c0_i32 = arith.constant 0 : i32
    %c0_i32_0 = arith.constant 0 : i32
    %c0_i32_1 = arith.constant 0 : i32
    %c0_i32_2 = arith.constant 0 : i32
    return %c0_i32, %c0_i32_0, %c0_i32_1 : i32, i32, i32
  }
  func.func @transform_9(%arg0: i32) -> (i32, i32, i32) {
    %c0_i32 = arith.constant 0 : i32
    %c0_i32_0 = arith.constant 0 : i32
    %c0_i32_1 = arith.constant 0 : i32
    %c0_i32_2 = arith.constant 0 : i32
    return %c0_i32, %c0_i32_0, %c0_i32_1 : i32, i32, i32
  }
  func.func @transform_10(%arg0: i32) -> (i32, i32, i32) {
    %c0_i32 = arith.constant 0 : i32
    %c0_i32_0 = arith.constant 0 : i32
    %c0_i32_1 = arith.constant 0 : i32
    %c0_i32_2 = arith.constant 0 : i32
    return %c0_i32, %c0_i32_0, %c0_i32_1 : i32, i32, i32
  }
  func.func @transform_11(%arg0: i32) -> (i32, i32) {
    %c0_i32 = arith.constant 0 : i32
    %c0_i32_0 = arith.constant 0 : i32
    %c0_i32_1 = arith.constant 0 : i32
    return %c0_i32, %c0_i32_0 : i32, i32
  }
  func.func @transform_12(%arg0: i32) -> (i32, i32) {
    %c0_i32 = arith.constant 0 : i32
    %c0_i32_0 = arith.constant 0 : i32
    %c0_i32_1 = arith.constant 0 : i32
    return %c0_i32, %c0_i32_0 : i32, i32
  }
  func.func @transform_13(%arg0: i32) -> (i32, i32) {
    %c0_i32 = arith.constant 0 : i32
    %c0_i32_0 = arith.constant 0 : i32
    %c0_i32_1 = arith.constant 0 : i32
    return %c0_i32, %c0_i32_0 : i32, i32
  }
}

</mosaic_0001>

<bundles_post_ra>
// kernel: agile_forward.1
= control target key start
LH: loop header
LB: loop body
LE: loop exit
PB: predicated region body
PF: predicated region fallthrough
CT: control target
= control target key end

     0   :  { %19 = vsyncpa [#allocation3], 0  ;;  %s2972_s0 = inlined_call_operand.vmem [shape: bf16[16,16], index: 0, kind: input, shape index: {}]   ;;  %s2973_s1 = inlined_call_operand.vmem [shape: bf16[16,16], index: 1, kind: input, shape index: {}]   ;;  %s2974_s2 = inlined_call_operand.vmem [shape: f32[16,1], index: 2, kind: input, shape index: {}]   ;;  %s2975_s3 = inlined_call_operand.vmem [shape: f32[8,16], index: 3, kind: input, shape index: {}]   ;;  %s2976_s4 = inlined_call_operand.vmem [shape: f32[8,1], index: 4, kind: input, shape index: {}]   ;;  %s2977_s5 = inlined_call_operand.vmem [shape: f32[16,128], index: 5, kind: input, shape index: {}]   ;;  %s2978_s6 = inlined_call_operand.hbm [shape: bf16[5,16,128], index: 6, kind: input, shape index: {}]   ;;  %s2979_s7 = inlined_call_operand.vmem [shape: bf16[5,128,128], index: 7, kind: input, shape index: {}]   ;;  %s2980_s8 = inlined_call_operand.hbm [shape: bf16[5,128,128], index: 8, kind: input, shape index: {}]   ;;  %s2981_s9 = inlined_call_operand.vmem [shape: f32[5,4,128], index: 9, kind: input, shape index: {}]   ;;  %s2982_s10 = inlined_call_operand.vmem [shape: bf16[4,128,128], index: 10, kind: input, shape index: {}]   ;;  %s2983_s11 = inlined_call_operand.vmem [shape: f32[4,128], index: 11, kind: input, shape index: {}]   ;;  %s2984_s12 = inlined_call_operand.vmem [shape: f32[8,128], index: 12, kind: output, shape index: {0}]   ;;  %s2985_s13 = inlined_call_operand.vmem [shape: f32[8,128], index: 13, kind: output, shape index: {1}]  }
   0x1   :  { %s37_s27 = sshll.u32 %s2978_s6, 4  ;;  %s38_s27 = int_to_ptr.hbm [resolvable:$true] %s37_s27 }
   0x2   :  { %20 = vsyncpa [#allocation5], 0  ;;  %s2542_s28 = smov [#allocation2]   ;;  %s52_s15 = sshll.u32 %s2980_s8, 4  ;;  %s53_s15 = int_to_ptr.hbm [resolvable:$true] %s52_s15 }
   0x3   :  { %s39_s29 = sshll.u32 %s2542_s28, 4  ;;  %s2543_s16 = smov 64   ;;  %s40_s29 = int_to_ptr.vmem [resolvable:$true] %s39_s29 }
   0x4   :  { %s2544_s17 = smov 4   ;;  %s2545_s18 = smov [#allocation4]  }
   0x5   :  { %45 = dma.hbm_to_vmem [thread:$0]  %s38_s27, 640, %s40_s29, [#allocation3], %s2543_s16, %s2543_s16, %s2544_s17  }
   0x6   :  { %s54_s19 = sshll.u32 %s2545_s18, 4  ;;  %s55_s19 = int_to_ptr.vmem [resolvable:$true] %s54_s19 }
   0x7   :  { %60 = dma.hbm_to_vmem [thread:$0]  %s53_s15, 5120, %s55_s19, [#allocation5], %s2543_s16, %s2543_s16, %s2544_s17  }
   0x8   :  { %2538 = dma.done.wait [#allocation3], 640  }
   0x9   :  { %2539 = vsyncadd [#allocation3], 4294966656 }
   0xa   :  { %2540 = dma.done.wait [#allocation5], 5120  }
   0xb   :  { %2541 = vsyncadd [#allocation5], 4294962176  ;;  %v2348_v0 = vld [vmem:[#allocation2] sm:$0xff]  ;;  %v83_v2 = vld [vmem:[%s2977_s5 + $0x8] sm:$0xff]  ;;  %vm99_vm0 = vcmask 130048   ;;  %v2546_v30 = vmov 0  }
   0xc   :  { %v82_v1 = vld [vmem:[%s2977_s5] sm:$0xff]  ;;  %v2356_v5 = vld [vmem:[%s2979_s7 + $0x38] sm:$0xff]  ;;  %110 = vmatpush.bf16.msra.mxu0 %v2348_v0  ;;  %v2355_v7 = vld [vmem:[%s2979_s7 + $0x30] sm:$0xff]  ;;  %2470 = vset.pattern.permute.xlu0 %v2546_v30 }
   0xd   :  { %v85_v3 = vpack.c.bf16 %v83_v2, %v82_v1  ;;  %v2632_v4 = vld [vmem:[%s2973_s1] sm:$0xff]  ;;  %205 = vmatpush.bf16.msra.mxu2 %v2356_v5  ;;  %v2354_v8 = vld [vmem:[%s2979_s7 + $0x28] sm:$0xff]  ;;  %v2352_v10 = vld [vmem:[%s2979_s7 + $0x18] sm:$0xff]  ;;  %2471 = vset.pattern.permute.xlu1 %v2546_v30 }
   0xe   :  { %v2640_v6 = vld [vmem:[%s2972_s0] sm:$0xff]  ;;  %v2351_v11 = vld [vmem:[%s2979_s7 + $0x10] sm:$0xff]  ;;  %v2350_v12 = vld [vmem:[%s2979_s7 + $0x8] sm:$0xff] }
   0xf   :  { %132 = vmatpush.bf16.msra.mxu1 %v85_v3  ;;  %1751 = vmatmul.msk.bf16.vlgmr.msra.gmra.mxu0 %vm99_vm0, %v2632_v4  ;;  %v2353_v9 = vld [vmem:[%s2979_s7 + $0x20] sm:$0xff]  ;;  %v2363_v15 = vld [vmem:[#allocation4 + $0x30] sm:$0xff]  ;;  %v2362_v16 = vld [vmem:[#allocation4 + $0x28] sm:$0xff] }
  0x10   :  { %v2349_v13 = vld [vmem:[%s2979_s7] sm:$0xff]  ;;  %v2361_v17 = vld [vmem:[#allocation4 + $0x20] sm:$0xff]  ;;  %v2359_v26 = vld [vmem:[#allocation4 + $0x10] sm:$0xff] }
  0x11   :  { %206 = vmatpush.bf16.msra.mxu2 %v2355_v7  ;;  %v2364_v14 = vld [vmem:[#allocation4 + $0x38] sm:$0xff]  ;;  %v2358_v27 = vld [vmem:[#allocation4 + $0x8] sm:$0xff]  ;;  %v2357_v28 = vld [vmem:[#allocation4] sm:$0xff] }
  0x12   :  { %1756 = vmatmul.msk.bf16.vlgmr.msra.gmra.mxu1 %vm99_vm0, %v2640_v6  ;;  %287 = vmatpush.bf16.msra.mxu3 %v2364_v14  ;;  %v2360_v25 = vld [vmem:[#allocation4 + $0x18] sm:$0xff]  ;;  %v81_v31 = vld [vmem:[%s2974_s2 + $0x8] sm:$0xff] }
  0x13   :  { %v80_v29 = vld [vmem:[%s2974_s2] sm:$0xff]  ;;  %v2365_v3 = vld [vmem:[#allocation2 + $0x8] sm:$0xff] }
  0x14   :  { %303 = vperm.xlu0 %2470, %v80_v29   ;;  %v2676_v32 = vld [vmem:[%s2981_s9] sm:$0xf]  ;;  %375 = vmatpush.bf16.msrb.mxu0 %v2365_v3  ;;  %v2371_v14 = vld [vmem:[%s2979_s7 + $0x68] sm:$0xff] }
  0x15   :  { %207 = vmatpush.bf16.msra.mxu2 %v2354_v8  ;;  %v156_v34 = vperm.slane %v2676_v32, 0  ;;  %v238_v43 = vperm.slane %v2676_v32, 1 }
  0x16   :  { %288 = vmatpush.bf16.msra.mxu3 %v2363_v15 }
  0x19   :  { %208 = vmatpush.bf16.msra.mxu2 %v2353_v9 }
  0x1a   :  { %289 = vmatpush.bf16.msra.mxu3 %v2362_v16 }
  0x1c   :  { %308 = vperm.xlu0 %2470, %v81_v31  }
  0x1d   :  { %209 = vmatpush.bf16.msra.mxu2 %v2352_v10 }
  0x1e   :  { %290 = vmatpush.bf16.msra.mxu3 %v2361_v17 }
  0x1f   :  { %1826 = vmatmul.msk.bf16.vlgmr.msrb.gmra.mxu0 %vm99_vm0, %v2632_v4 }
  0x21   :  { %210 = vmatpush.bf16.msra.mxu2 %v2351_v11 }
  0x22   :  { %291 = vmatpush.bf16.msra.mxu3 %v2360_v25  ;;  %v351_v25 = vperm.slane %v2676_v32, 3 }
  0x25   :  { %211 = vmatpush.bf16.msra.mxu2 %v2350_v12  ;;  %v2373_v12 = vld [vmem:[%s2979_s7 + $0x78] sm:$0xff] }
  0x26   :  { %292 = vmatpush.bf16.msra.mxu3 %v2359_v26  ;;  %463 = vmatpush.bf16.msra.mxu0 %v2373_v12 }
  0x29   :  { %212 = vmatpush.bf16.msra.mxu2 %v2349_v13  ;;  %v2372_v13 = vld [vmem:[%s2979_s7 + $0x70] sm:$0xff] }
  0x2a   :  { %293 = vmatpush.bf16.msra.mxu3 %v2358_v27  ;;  %464 = vmatpush.bf16.msra.mxu0 %v2372_v13 }
  0x2e   :  { %294 = vmatpush.bf16.msra.mxu3 %v2357_v28  ;;  %465 = vmatpush.bf16.msra.mxu0 %v2371_v14 }
  0x86   :  { %v2679_v41 = vpop.permute.xlu0 %303 }
  0x8c   :  { %v112_v18 = vpop.f32.mrf.mxu0 }
  0x8e   :  { %v2682_v47 = vpop.permute.xlu0 %308 }
  0x8f   :  { %v134_v19 = vpop.f32.mrf.mxu1 }
  0x90   :  { %v135_v22 = vadd.f32 %v134_v19, %v112_v18 }
  0x94   :  { %v114_v20 = vpop.f32.mrf.mxu0 }
  0x97   :  { %v136_v21 = vpop.f32.mrf.mxu1 }
  0x98   :  { %v137_v23 = vadd.f32 %v136_v21, %v114_v20  ;;  %v348_v21 = vperm.slane %v2676_v32, 2  ;;  %v2369_v32 = vld [vmem:[%s2979_s7 + $0x58] sm:$0xff] }
  0x9a   :  { %v139_v24 = vpack.c.bf16 %v137_v23, %v135_v22 }
  0x9c   :  { %213 = vmatmul.bf16.vlgmr.msra.gmra.mxu2 %v139_v24 }
 0x11f   :  { %v214_v33 = vpop.f32.mrf.mxu2 }
 0x120   :  { %v215_v35 = vadd.f32 %v214_v33, %v156_v34 }
 0x122   :  { %v219_v38 = vmax.f32 %v215_v35, 0.0  ;;  %v2368_v35 = vld [vmem:[%s2979_s7 + $0x50] sm:$0xff] }
 0x127   :  { %v216_v36 = vpop.f32.mrf.mxu2 }
 0x128   :  { %v217_v37 = vadd.f32 %v216_v36, %v156_v34  ;;  %v2370_v34 = vld [vmem:[%s2979_s7 + $0x60] sm:$0xff]  ;;  %v2367_v36 = vld [vmem:[%s2979_s7 + $0x48] sm:$0xff] }
 0x129   :  { %466 = vmatpush.bf16.msra.mxu0 %v2370_v34  ;;  %v2390_v34 = vld [vmem:[%s2979_s7 + $0xb8] sm:$0xff] }
 0x12a   :  { %v220_v39 = vmax.f32 %v217_v37, 0.0  ;;  %v2366_v37 = vld [vmem:[%s2979_s7 + $0x40] sm:$0xff]  ;;  %712 = vmatpush.bf16.msrb.mxu2 %v2390_v34 }
 0x12c   :  { %v221_v40 = vpack.c.bf16 %v220_v39, %v219_v38  ;;  %v2381_v38 = vld [vmem:[#allocation4 + $0x78] sm:$0xff]  ;;  %v2380_v39 = vld [vmem:[#allocation4 + $0x70] sm:$0xff] }
 0x12d   :  { %467 = vmatpush.bf16.msra.mxu0 %v2369_v32  ;;  %v2389_v32 = vld [vmem:[%s2979_s7 + $0xb0] sm:$0xff] }
 0x12e   :  { %295 = vmatmul.bf16.vlgmr.msra.gmra.mxu3 %v221_v40  ;;  %v2379_v40 = vld [vmem:[#allocation4 + $0x68] sm:$0xff]  ;;  %713 = vmatpush.bf16.msrb.mxu2 %v2389_v32 }
 0x131   :  { %468 = vmatpush.bf16.msra.mxu0 %v2368_v35  ;;  %v2388_v35 = vld [vmem:[%s2979_s7 + $0xa8] sm:$0xff] }
 0x132   :  { %714 = vmatpush.bf16.msrb.mxu2 %v2388_v35 }
 0x135   :  { %469 = vmatpush.bf16.msra.mxu0 %v2367_v36 }
 0x139   :  { %470 = vmatpush.bf16.msra.mxu0 %v2366_v37 }
 0x1b1   :  { %v296_v42 = vpop.f32.mrf.mxu3 }
 0x1b2   :  { %v297_v44 = vadd.f32 %v296_v42, %v238_v43  ;;  %v2378_v42 = vld [vmem:[#allocation4 + $0x60] sm:$0xff] }
 0x1b4   :  { %v311_v48 = vmul.f32 %v2679_v41, %v297_v44 }
 0x1b9   :  { %v298_v45 = vpop.f32.mrf.mxu3 }
 0x1ba   :  { %v299_v46 = vadd.f32 %v298_v45, %v238_v43  ;;  %v377_v43 = vpop.f32.mrf.mxu0 }
 0x1bc   :  { %v312_v49 = vmul.f32 %v2682_v47, %v299_v46 }
 0x1be   :  { %v313_v50 = vadd.f32 %v312_v49, %v311_v48 }
 0x1c0   :  { %v314_v51 = vrot.slane %v313_v50, 4 }
 0x1c2   :  { %v315_v52 = vadd.f32 %v314_v51, %v313_v50  ;;  %v379_v45 = vpop.f32.mrf.mxu0  ;;  %v2377_v51 = vld [vmem:[#allocation4 + $0x58] sm:$0xff] }
 0x1c4   :  { %v316_v53 = vrot.slane %v315_v52, 2 }
 0x1c6   :  { %v317_v54 = vadd.f32 %v316_v53, %v315_v52  ;;  %v2376_v52 = vld [vmem:[#allocation4 + $0x50] sm:$0xff]  ;;  %v2375_v53 = vld [vmem:[#allocation4 + $0x48] sm:$0xff] }
 0x1c8   :  { %v318_v55 = vrot.slane %v317_v54, 1 }
 0x1ca   :  { %v319_v56 = vadd.f32 %v318_v55, %v317_v54  ;;  %v2374_v54 = vld [vmem:[#allocation4 + $0x40] sm:$0xff]  ;;  %v2721_v55 = vld [vmem:[%s2981_s9 + $0x4] sm:$0xf] }
 0x1cc   :  { %v320_v57 = vmul.f32 0.0625, %v319_v56 }
 0x1ce   :  { %v321_v58 = vsub.f32 %v297_v44, %v320_v57  ;;  %v322_v59 = vsub.f32 %v299_v46, %v320_v57  ;;  %v414_v57 = vperm.slane %v2721_v55, 0 }
 0x1d0   :  { %v323_v60 = vmul.f32 %v321_v58, %v321_v58  ;;  %v324_v61 = vmul.f32 %v322_v59, %v322_v59 }
 0x1d2   :  { %v325_v62 = vmul.f32 %v323_v60, %v2679_v41  ;;  %v326_v63 = vmul.f32 %v324_v61, %v2682_v47 }
 0x1d4   :  { %v327_v0 = vadd.f32 %v326_v63, %v325_v62 }
 0x1d6   :  { %v328_v1 = vrot.slane %v327_v0, 4 }
 0x1d8   :  { %v329_v2 = vadd.f32 %v328_v1, %v327_v0  ;;  %v497_v1 = vperm.slane %v2721_v55, 1 }
 0x1da   :  { %v330_v5 = vrot.slane %v329_v2, 2 }
 0x1dc   :  { %v331_v7 = vadd.f32 %v330_v5, %v329_v2 }
 0x1de   :  { %v332_v8 = vrot.slane %v331_v7, 1 }
 0x1e0   :  { %v333_v9 = vadd.f32 %v332_v8, %v331_v7 }
 0x1e2   :  { %v334_v10 = vmul.f32 0.0625, %v333_v9 }
 0x1e4   :  { %v335_v11 = vadd.f32 1e-05, %v334_v10 }
 0x1e6   :  { %2472 = vrsqrt.f32 %v335_v11  ;;  %vm342_vm2 = vweird.f32 %v335_v11 }
 0x1ec   :  { %v2473_v15 = vpop.eup %2472 }
 0x1ed   :  { %v337_v16 = vmul.f32 %v2473_v15, %v335_v11  ;;  %vm343_vm1 = vweird.f32 %v2473_v15 }
 0x1ee   :  { %vm344_vm3 = vmor %vm342_vm2, %vm343_vm1 }
 0x1ef   :  { %v338_v17 = vmul.f32 %v2473_v15, %v337_v16 }
 0x1f1   :  { %v339_v18 = vmul.f32 0.5, %v338_v17 }
 0x1f3   :  { %v340_v19 = vsub.f32 1.5, %v339_v18 }
 0x1f5   :  { %v341_v20 = vmul.f32 %v2473_v15, %v340_v19 }
 0x1f7   :  { %v345_v22 = vsel %vm344_vm3, %v2473_v15, %v341_v20 }
 0x1f8   :  { %v346_v23 = vmul.f32 %v345_v22, %v321_v58  ;;  %v347_v24 = vmul.f32 %v345_v22, %v322_v59 }
 0x1fa   :  { %v349_v26 = vmul.f32 %v348_v21, %v346_v23  ;;  %v350_v27 = vmul.f32 %v348_v21, %v347_v24 }
 0x1fc   :  { %v352_v28 = vadd.f32 %v351_v25, %v349_v26  ;;  %v353_v29 = vadd.f32 %v351_v25, %v350_v27  ;;  %v2382_v26 = vld [vmem:[#allocation2 + $0x10] sm:$0xff] }
 0x1fe   :  { %v354_v30 = vmax.f32 %v352_v28, 0.0  ;;  %v355_v31 = vmax.f32 %v353_v29, 0.0 }
 0x200   :  { %v358_v33 = vpack.c.bf16 %v355_v31, %v354_v30 }
 0x202   :  { %389 = vmatpush.bf16.msrb.mxu1 %v358_v33 }
 0x205   :  { %1827 = vmatmul.msk.bf16.vlgmr.msrb.gmra.mxu1 %vm99_vm0, %v2640_v6 }
 0x206   :  { %546 = vmatpush.bf16.msra.mxu1 %v2381_v38 }
 0x20a   :  { %547 = vmatpush.bf16.msra.mxu1 %v2380_v39 }
 0x20e   :  { %548 = vmatpush.bf16.msra.mxu1 %v2379_v40 }
 0x212   :  { %549 = vmatpush.bf16.msra.mxu1 %v2378_v42 }
 0x216   :  { %550 = vmatpush.bf16.msra.mxu1 %v2377_v51 }
 0x21a   :  { %551 = vmatpush.bf16.msra.mxu1 %v2376_v52 }
 0x21e   :  { %552 = vmatpush.bf16.msra.mxu1 %v2375_v53 }
 0x222   :  { %553 = vmatpush.bf16.msra.mxu1 %v2374_v54 }
 0x226   :  { %624 = vmatpush.bf16.msrb.mxu1 %v2382_v26 }
 0x282   :  { %v391_v44 = vpop.f32.mrf.mxu1 }
 0x283   :  { %v392_v48 = vadd.f32 %v391_v44, %v377_v43  ;;  %v597_v43 = vperm.slane %v2721_v55, 2 }
 0x28a   :  { %v393_v46 = vpop.f32.mrf.mxu1 }
 0x28b   :  { %v394_v49 = vadd.f32 %v393_v46, %v379_v45 }
 0x28d   :  { %v396_v50 = vpack.c.bf16 %v394_v49, %v392_v48  ;;  %v600_v48 = vperm.slane %v2721_v55, 3  ;;  %v2386_v55 = vld [vmem:[%s2979_s7 + $0x98] sm:$0xff] }
 0x28f   :  { %471 = vmatmul.bf16.vlgmr.msra.gmra.mxu0 %v396_v50 }
 0x30c   :  { %v472_v56 = vpop.f32.mrf.mxu0 }
 0x30d   :  { %v473_v58 = vadd.f32 %v472_v56, %v414_v57 }
 0x30f   :  { %v477_v61 = vmax.f32 %v473_v58, 0.0  ;;  %v2385_v58 = vld [vmem:[%s2979_s7 + $0x90] sm:$0xff] }
 0x314   :  { %v474_v59 = vpop.f32.mrf.mxu0 }
 0x315   :  { %v475_v60 = vadd.f32 %v474_v59, %v414_v57  ;;  %v2387_v57 = vld [vmem:[%s2979_s7 + $0xa0] sm:$0xff]  ;;  %v2384_v59 = vld [vmem:[%s2979_s7 + $0x88] sm:$0xff] }
 0x316   :  { %715 = vmatpush.bf16.msrb.mxu2 %v2387_v57  ;;  %v2407_v57 = vld [vmem:[%s2979_s7 + $0xf8] sm:$0xff] }
 0x317   :  { %v478_v62 = vmax.f32 %v475_v60, 0.0  ;;  %v2383_v60 = vld [vmem:[%s2979_s7 + $0x80] sm:$0xff] }
 0x319   :  { %v479_v63 = vpack.c.bf16 %v478_v62, %v477_v61  ;;  %v2398_v61 = vld [vmem:[#allocation4 + $0xb8] sm:$0xff]  ;;  %v2397_v62 = vld [vmem:[#allocation4 + $0xb0] sm:$0xff] }
 0x31a   :  { %716 = vmatpush.bf16.msrb.mxu2 %v2386_v55  ;;  %v2406_v55 = vld [vmem:[%s2979_s7 + $0xf0] sm:$0xff] }
 0x31b   :  { %554 = vmatmul.bf16.vlgmr.msra.gmra.mxu1 %v479_v63  ;;  %v2396_v63 = vld [vmem:[#allocation4 + $0xa8] sm:$0xff] }
 0x31e   :  { %717 = vmatpush.bf16.msrb.mxu2 %v2385_v58  ;;  %v2405_v58 = vld [vmem:[%s2979_s7 + $0xe8] sm:$0xff] }
 0x322   :  { %718 = vmatpush.bf16.msrb.mxu2 %v2384_v59 }
 0x326   :  { %719 = vmatpush.bf16.msrb.mxu2 %v2383_v60 }
 0x32b   :  { %1913 = vmatmul.msk.bf16.vlgmr.msrb.gmra.mxu1 %vm99_vm0, %v2632_v4 }
 0x398   :  { %v555_v0 = vpop.f32.mrf.mxu1 }
 0x399   :  { %v556_v2 = vadd.f32 %v555_v0, %v497_v1  ;;  %v2395_v0 = vld [vmem:[#allocation4 + $0xa0] sm:$0xff] }
 0x39b   :  { %v560_v7 = vmul.f32 %v556_v2, %v2679_v41 }
 0x3a0   :  { %v557_v3 = vpop.f32.mrf.mxu1 }
 0x3a1   :  { %v558_v5 = vadd.f32 %v557_v3, %v497_v1 }
 0x3a3   :  { %v561_v8 = vmul.f32 %v558_v5, %v2682_v47 }
 0x3a5   :  { %v562_v9 = vadd.f32 %v561_v8, %v560_v7 }
 0x3a7   :  { %v563_v10 = vrot.slane %v562_v9, 4 }
 0x3a8   :  { %v626_v1 = vpop.f32.mrf.mxu1 }
 0x3a9   :  { %v564_v11 = vadd.f32 %v563_v10, %v562_v9  ;;  %v2394_v10 = vld [vmem:[#allocation4 + $0x98] sm:$0xff] }
 0x3ab   :  { %v565_v12 = vrot.slane %v564_v11, 2 }
 0x3ad   :  { %v566_v13 = vadd.f32 %v565_v12, %v564_v11  ;;  %v2393_v11 = vld [vmem:[#allocation4 + $0x90] sm:$0xff]  ;;  %v2392_v12 = vld [vmem:[#allocation4 + $0x88] sm:$0xff] }
 0x3af   :  { %v567_v14 = vrot.slane %v566_v13, 1 }
 0x3b0   :  { %v628_v3 = vpop.f32.mrf.mxu1 }
 0x3b1   :  { %v568_v15 = vadd.f32 %v567_v14, %v566_v13  ;;  %v2391_v13 = vld [vmem:[#allocation4 + $0x80] sm:$0xff] }
 0x3b2   :  { %v2762_v14 = vld [vmem:[%s2981_s9 + $0x8] sm:$0xf] }
 0x3b3   :  { %v569_v16 = vmul.f32 0.0625, %v568_v15 }
 0x3b5   :  { %v570_v17 = vsub.f32 %v556_v2, %v569_v16  ;;  %v571_v18 = vsub.f32 %v558_v5, %v569_v16  ;;  %v663_v16 = vperm.slane %v2762_v14, 0 }
 0x3b7   :  { %v572_v19 = vmul.f32 %v570_v17, %v570_v17  ;;  %v573_v20 = vmul.f32 %v571_v18, %v571_v18 }
 0x3b9   :  { %v574_v21 = vmul.f32 %v572_v19, %v2679_v41  ;;  %v575_v22 = vmul.f32 %v573_v20, %v2682_v47 }
 0x3bb   :  { %v576_v23 = vadd.f32 %v575_v22, %v574_v21 }
 0x3bd   :  { %v577_v24 = vrot.slane %v576_v23, 4 }
 0x3bf   :  { %v578_v25 = vadd.f32 %v577_v24, %v576_v23  ;;  %v746_v24 = vperm.slane %v2762_v14, 1 }
 0x3c1   :  { %v579_v27 = vrot.slane %v578_v25, 2 }
 0x3c3   :  { %v580_v28 = vadd.f32 %v579_v27, %v578_v25 }
 0x3c5   :  { %v581_v29 = vrot.slane %v580_v28, 1 }
 0x3c7   :  { %v582_v30 = vadd.f32 %v581_v29, %v580_v28 }
 0x3c9   :  { %v583_v31 = vmul.f32 0.0625, %v582_v30 }
 0x3cb   :  { %v584_v33 = vadd.f32 1e-05, %v583_v31 }
 0x3cd   :  { %2474 = vrsqrt.f32 %v584_v33  ;;  %vm591_vm5 = vweird.f32 %v584_v33 }
 0x3d3   :  { %v2475_v36 = vpop.eup %2474 }
 0x3d4   :  { %v586_v37 = vmul.f32 %v2475_v36, %v584_v33  ;;  %vm592_vm4 = vweird.f32 %v2475_v36 }
 0x3d5   :  { %vm593_vm6 = vmor %vm591_vm5, %vm592_vm4 }
 0x3d6   :  { %v587_v38 = vmul.f32 %v2475_v36, %v586_v37 }
 0x3d8   :  { %v588_v39 = vmul.f32 0.5, %v587_v38 }
 0x3da   :  { %v589_v40 = vsub.f32 1.5, %v588_v39 }
 0x3dc   :  { %v590_v42 = vmul.f32 %v2475_v36, %v589_v40 }
 0x3de   :  { %v594_v44 = vsel %vm593_vm6, %v2475_v36, %v590_v42 }
 0x3df   :  { %v595_v45 = vmul.f32 %v594_v44, %v570_v17  ;;  %v596_v46 = vmul.f32 %v594_v44, %v571_v18 }
 0x3e1   :  { %v598_v49 = vmul.f32 %v597_v43, %v595_v45  ;;  %v599_v50 = vmul.f32 %v597_v43, %v596_v46 }
 0x3e3   :  { %v601_v51 = vadd.f32 %v600_v48, %v598_v49  ;;  %v602_v52 = vadd.f32 %v600_v48, %v599_v50  ;;  %v2399_v49 = vld [vmem:[#allocation2 + $0x18] sm:$0xff] }
 0x3e4   :  { %873 = vmatpush.bf16.msrb.mxu0 %v2399_v49 }
 0x3e5   :  { %v603_v53 = vmax.f32 %v601_v51, 0.0  ;;  %v604_v54 = vmax.f32 %v602_v52, 0.0 }
 0x3e7   :  { %v607_v56 = vpack.c.bf16 %v604_v54, %v603_v53  ;;  %2000 = vmatmul.msk.bf16.vlgmr.msrb.gmra.mxu0 %vm99_vm0, %v2632_v4 }
 0x3e8   :  { %961 = vmatpush.bf16.msra.mxu0 %v2407_v57 }
 0x3e9   :  { %638 = vmatpush.bf16.msrb.mxu3 %v607_v56 }
 0x3ec   :  { %1914 = vmatmul.msk.bf16.vlgmr.msrb.gmra.mxu3 %vm99_vm0, %v2640_v6  ;;  %962 = vmatpush.bf16.msra.mxu0 %v2406_v55 }
 0x3ed   :  { %795 = vmatpush.bf16.msra.mxu3 %v2398_v61 }
 0x3f0   :  { %963 = vmatpush.bf16.msra.mxu0 %v2405_v58 }
 0x3f1   :  { %796 = vmatpush.bf16.msra.mxu3 %v2397_v62 }
 0x3f5   :  { %797 = vmatpush.bf16.msra.mxu3 %v2396_v63 }
 0x3f9   :  { %798 = vmatpush.bf16.msra.mxu3 %v2395_v0 }
 0x3fd   :  { %799 = vmatpush.bf16.msra.mxu3 %v2394_v10 }
 0x401   :  { %800 = vmatpush.bf16.msra.mxu3 %v2393_v11 }
 0x405   :  { %801 = vmatpush.bf16.msra.mxu3 %v2392_v12 }
 0x409   :  { %802 = vmatpush.bf16.msra.mxu3 %v2391_v13 }
 0x46f   :  { %v640_v2 = vpop.f32.mrf.mxu3 }
 0x470   :  { %v641_v7 = vadd.f32 %v640_v2, %v626_v1  ;;  %v846_v1 = vperm.slane %v2762_v14, 2 }
 0x477   :  { %v642_v5 = vpop.f32.mrf.mxu3 }
 0x478   :  { %v643_v8 = vadd.f32 %v642_v5, %v628_v3 }
 0x47a   :  { %v645_v9 = vpack.c.bf16 %v643_v8, %v641_v7  ;;  %v849_v7 = vperm.slane %v2762_v14, 3  ;;  %v2403_v14 = vld [vmem:[%s2979_s7 + $0xd8] sm:$0xff] }
 0x47c   :  { %720 = vmatmul.bf16.vlgmr.msrb.gmra.mxu2 %v645_v9 }
 0x4ff   :  { %v721_v15 = vpop.f32.mrf.mxu2 }
 0x500   :  { %v722_v17 = vadd.f32 %v721_v15, %v663_v16 }
 0x502   :  { %v726_v20 = vmax.f32 %v722_v17, 0.0  ;;  %v2402_v17 = vld [vmem:[%s2979_s7 + $0xd0] sm:$0xff] }
 0x507   :  { %v723_v18 = vpop.f32.mrf.mxu2 }
 0x508   :  { %v724_v19 = vadd.f32 %v723_v18, %v663_v16  ;;  %v2404_v16 = vld [vmem:[%s2979_s7 + $0xe0] sm:$0xff]  ;;  %v2401_v18 = vld [vmem:[%s2979_s7 + $0xc8] sm:$0xff] }
 0x509   :  { %964 = vmatpush.bf16.msra.mxu0 %v2404_v16  ;;  %v2424_v16 = vld [vmem:[%s2979_s7 + $0x138] sm:$0xff] }
 0x50a   :  { %v727_v21 = vmax.f32 %v724_v19, 0.0  ;;  %v2400_v19 = vld [vmem:[%s2979_s7 + $0xc0] sm:$0xff] }
 0x50c   :  { %v728_v22 = vpack.c.bf16 %v727_v21, %v726_v20  ;;  %v2415_v20 = vld [vmem:[#allocation4 + $0xf8] sm:$0xff]  ;;  %v2414_v21 = vld [vmem:[#allocation4 + $0xf0] sm:$0xff] }
 0x50d   :  { %965 = vmatpush.bf16.msra.mxu0 %v2403_v14  ;;  %v2423_v14 = vld [vmem:[%s2979_s7 + $0x130] sm:$0xff] }
 0x50e   :  { %803 = vmatmul.bf16.vlgmr.msra.gmra.mxu3 %v728_v22  ;;  %v2413_v22 = vld [vmem:[#allocation4 + $0xe8] sm:$0xff] }
 0x511   :  { %966 = vmatpush.bf16.msra.mxu0 %v2402_v17  ;;  %v2422_v17 = vld [vmem:[%s2979_s7 + $0x128] sm:$0xff] }
 0x515   :  { %967 = vmatpush.bf16.msra.mxu0 %v2401_v18 }
 0x519   :  { %968 = vmatpush.bf16.msra.mxu0 %v2400_v19 }
 0x591   :  { %v804_v23 = vpop.f32.mrf.mxu3 }
 0x592   :  { %v805_v25 = vadd.f32 %v804_v23, %v746_v24  ;;  %v2412_v23 = vld [vmem:[#allocation4 + $0xe0] sm:$0xff] }
 0x594   :  { %v809_v28 = vmul.f32 %v805_v25, %v2679_v41 }
 0x599   :  { %v806_v26 = vpop.f32.mrf.mxu3 }
 0x59a   :  { %v807_v27 = vadd.f32 %v806_v26, %v746_v24  ;;  %v875_v24 = vpop.f32.mrf.mxu0 }
 0x59c   :  { %v810_v29 = vmul.f32 %v807_v27, %v2682_v47 }
 0x59e   :  { %v811_v30 = vadd.f32 %v810_v29, %v809_v28 }
 0x5a0   :  { %v812_v31 = vrot.slane %v811_v30, 4 }
 0x5a2   :  { %v813_v33 = vadd.f32 %v812_v31, %v811_v30  ;;  %v877_v26 = vpop.f32.mrf.mxu0  ;;  %v2411_v31 = vld [vmem:[#allocation4 + $0xd8] sm:$0xff] }
 0x5a4   :  { %v814_v34 = vrot.slane %v813_v33, 2 }
 0x5a6   :  { %v815_v32 = vadd.f32 %v814_v34, %v813_v33  ;;  %v2410_v33 = vld [vmem:[#allocation4 + $0xd0] sm:$0xff]  ;;  %v2409_v34 = vld [vmem:[#allocation4 + $0xc8] sm:$0xff] }
 0x5a8   :  { %v816_v35 = vrot.slane %v815_v32, 1 }
 0x5aa   :  { %v817_v36 = vadd.f32 %v816_v35, %v815_v32  ;;  %v2408_v32 = vld [vmem:[#allocation4 + $0xc0] sm:$0xff] }
 0x5ab   :  { %v2803_v35 = vld [vmem:[%s2981_s9 + $0xc] sm:$0xf] }
 0x5ac   :  { %v818_v37 = vmul.f32 0.0625, %v817_v36 }
 0x5ae   :  { %v819_v38 = vsub.f32 %v805_v25, %v818_v37  ;;  %v820_v39 = vsub.f32 %v807_v27, %v818_v37  ;;  %v912_v37 = vperm.slane %v2803_v35, 0 }
 0x5b0   :  { %v821_v40 = vmul.f32 %v819_v38, %v819_v38  ;;  %v822_v42 = vmul.f32 %v820_v39, %v820_v39 }
 0x5b2   :  { %v823_v43 = vmul.f32 %v821_v40, %v2679_v41  ;;  %v824_v44 = vmul.f32 %v822_v42, %v2682_v47 }
 0x5b4   :  { %v825_v45 = vadd.f32 %v824_v44, %v823_v43 }
 0x5b6   :  { %v826_v46 = vrot.slane %v825_v45, 4 }
 0x5b8   :  { %v827_v48 = vadd.f32 %v826_v46, %v825_v45  ;;  %v995_v46 = vperm.slane %v2803_v35, 1 }
 0x5ba   :  { %v828_v50 = vrot.slane %v827_v48, 2 }
 0x5bc   :  { %v829_v51 = vadd.f32 %v828_v50, %v827_v48 }
 0x5be   :  { %v830_v52 = vrot.slane %v829_v51, 1 }
 0x5c0   :  { %v831_v53 = vadd.f32 %v830_v52, %v829_v51 }
 0x5c2   :  { %v832_v54 = vmul.f32 0.0625, %v831_v53 }
 0x5c4   :  { %v833_v56 = vadd.f32 1e-05, %v832_v54 }
 0x5c6   :  { %2476 = vrsqrt.f32 %v833_v56  ;;  %vm840_vm8 = vweird.f32 %v833_v56 }
 0x5cc   :  { %v2477_v59 = vpop.eup %2476 }
 0x5cd   :  { %v835_v60 = vmul.f32 %v2477_v59, %v833_v56  ;;  %vm841_vm7 = vweird.f32 %v2477_v59 }
 0x5ce   :  { %vm842_vm9 = vmor %vm840_vm8, %vm841_vm7 }
 0x5cf   :  { %v836_v61 = vmul.f32 %v2477_v59, %v835_v60 }
 0x5d1   :  { %v837_v62 = vmul.f32 0.5, %v836_v61 }
 0x5d3   :  { %v838_v63 = vsub.f32 1.5, %v837_v62 }
 0x5d5   :  { %v839_v0 = vmul.f32 %v2477_v59, %v838_v63 }
 0x5d7   :  { %v843_v2 = vsel %vm842_vm9, %v2477_v59, %v839_v0 }
 0x5d8   :  { %v844_v3 = vmul.f32 %v843_v2, %v819_v38  ;;  %v845_v5 = vmul.f32 %v843_v2, %v820_v39 }
 0x5da   :  { %v847_v8 = vmul.f32 %v846_v1, %v844_v3  ;;  %v848_v9 = vmul.f32 %v846_v1, %v845_v5 }
 0x5dc   :  { %v851_v10 = vadd.f32 %v849_v7, %v848_v9  ;;  %v850_v11 = vadd.f32 %v849_v7, %v847_v8  ;;  %v2416_v8 = vld [vmem:[#allocation2 + $0x20] sm:$0xff] }
 0x5dd   :  { %1122 = vmatpush.bf16.msra.mxu2 %v2416_v8 }
 0x5de   :  { %v853_v12 = vmax.f32 %v851_v10, 0.0  ;;  %v852_v13 = vmax.f32 %v850_v11, 0.0 }
 0x5e0   :  { %v856_v15 = vpack.c.bf16 %v853_v12, %v852_v13  ;;  %2087 = vmatmul.msk.bf16.vlgmr.msra.gmra.mxu2 %vm99_vm0, %v2632_v4 }
 0x5e1   :  { %1210 = vmatpush.bf16.msrb.mxu2 %v2424_v16 }
 0x5e2   :  { %887 = vmatpush.bf16.msra.mxu1 %v856_v15 }
 0x5e5   :  { %2001 = vmatmul.msk.bf16.vlgmr.msra.gmra.mxu1 %vm99_vm0, %v2640_v6  ;;  %1211 = vmatpush.bf16.msrb.mxu2 %v2423_v14 }
 0x5e6   :  { %1044 = vmatpush.bf16.msrb.mxu1 %v2415_v20 }
 0x5e9   :  { %1212 = vmatpush.bf16.msrb.mxu2 %v2422_v17 }
 0x5ea   :  { %1045 = vmatpush.bf16.msrb.mxu1 %v2414_v21 }
 0x5ee   :  { %1046 = vmatpush.bf16.msrb.mxu1 %v2413_v22 }
 0x5f2   :  { %1047 = vmatpush.bf16.msrb.mxu1 %v2412_v23  ;;  %v1095_v23 = vperm.slane %v2803_v35, 2 }
 0x5f6   :  { %1048 = vmatpush.bf16.msrb.mxu1 %v2411_v31 }
 0x5fa   :  { %1049 = vmatpush.bf16.msrb.mxu1 %v2410_v33 }
 0x5fe   :  { %1050 = vmatpush.bf16.msrb.mxu1 %v2409_v34 }
 0x602   :  { %1051 = vmatpush.bf16.msrb.mxu1 %v2408_v32 }
 0x662   :  { %v889_v25 = vpop.f32.mrf.mxu1 }
 0x663   :  { %v890_v28 = vadd.f32 %v889_v25, %v875_v24 }
 0x66a   :  { %v891_v27 = vpop.f32.mrf.mxu1 }
 0x66b   :  { %v892_v29 = vadd.f32 %v891_v27, %v877_v26  ;;  %v1098_v27 = vperm.slane %v2803_v35, 3  ;;  %v2420_v35 = vld [vmem:[%s2979_s7 + $0x118] sm:$0xff] }
 0x66d   :  { %v894_v30 = vpack.c.bf16 %v892_v29, %v890_v28 }
 0x66f   :  { %969 = vmatmul.bf16.vlgmr.msra.gmra.mxu0 %v894_v30 }
 0x6ec   :  { %v970_v36 = vpop.f32.mrf.mxu0 }
 0x6ed   :  { %v971_v38 = vadd.f32 %v970_v36, %v912_v37  ;;  %v2421_v36 = vld [vmem:[%s2979_s7 + $0x120] sm:$0xff] }
 0x6ee   :  { %1213 = vmatpush.bf16.msrb.mxu2 %v2421_v36 }
 0x6ef   :  { %v975_v42 = vmax.f32 %v971_v38, 0.0  ;;  %v2418_v38 = vld [vmem:[%s2979_s7 + $0x108] sm:$0xff] }
 0x6f2   :  { %1214 = vmatpush.bf16.msrb.mxu2 %v2420_v35 }
 0x6f4   :  { %v972_v39 = vpop.f32.mrf.mxu0 }
 0x6f5   :  { %v973_v40 = vadd.f32 %v972_v39, %v912_v37  ;;  %v2419_v37 = vld [vmem:[%s2979_s7 + $0x110] sm:$0xff]  ;;  %v2432_v39 = vld [vmem:[#allocation4 + $0x138] sm:$0xff] }
 0x6f6   :  { %1215 = vmatpush.bf16.msrb.mxu2 %v2419_v37 }
 0x6f7   :  { %v976_v43 = vmax.f32 %v973_v40, 0.0  ;;  %v2431_v40 = vld [vmem:[#allocation4 + $0x130] sm:$0xff] }
 0x6f9   :  { %v977_v44 = vpack.c.bf16 %v976_v43, %v975_v42  ;;  %v2430_v42 = vld [vmem:[#allocation4 + $0x128] sm:$0xff]  ;;  %v2429_v43 = vld [vmem:[#allocation4 + $0x120] sm:$0xff] }
 0x6fa   :  { %1216 = vmatpush.bf16.msrb.mxu2 %v2418_v38  ;;  %v2436_v38 = vld [vmem:[%s2982_s10 + $0x18] sm:$0xff] }
 0x6fb   :  { %1052 = vmatmul.bf16.vlgmr.msrb.gmra.mxu1 %v977_v44  ;;  %v1124_v44 = vpop.f32.mrf.mxu2 }
 0x778   :  { %v1053_v45 = vpop.f32.mrf.mxu1 }
 0x779   :  { %v1054_v48 = vadd.f32 %v1053_v45, %v995_v46 }
 0x77b   :  { %v1058_v51 = vmul.f32 %v1054_v48, %v2679_v41 }
 0x780   :  { %v1055_v49 = vpop.f32.mrf.mxu1 }
 0x781   :  { %v1056_v50 = vadd.f32 %v1055_v49, %v995_v46  ;;  %v1126_v46 = vpop.f32.mrf.mxu2 }
 0x783   :  { %v1059_v52 = vmul.f32 %v1056_v50, %v2682_v47 }
 0x785   :  { %v1060_v53 = vadd.f32 %v1059_v52, %v1058_v51  ;;  %v2428_v52 = vld [vmem:[#allocation4 + $0x118] sm:$0xff] }
 0x787   :  { %v1061_v54 = vrot.slane %v1060_v53, 4 }
 0x789   :  { %v1062_v56 = vadd.f32 %v1061_v54, %v1060_v53  ;;  %v2427_v53 = vld [vmem:[#allocation4 + $0x110] sm:$0xff]  ;;  %v2426_v54 = vld [vmem:[#allocation4 + $0x108] sm:$0xff] }
 0x78b   :  { %v1063_v57 = vrot.slane %v1062_v56, 2 }
 0x78d   :  { %v1064_v55 = vadd.f32 %v1063_v57, %v1062_v56  ;;  %v2425_v56 = vld [vmem:[#allocation4 + $0x100] sm:$0xff]  ;;  %v2844_v57 = vld [vmem:[%s2981_s9 + $0x10] sm:$0xf] }
 0x78f   :  { %v1065_v58 = vrot.slane %v1064_v55, 1 }
 0x791   :  { %v1066_v59 = vadd.f32 %v1065_v58, %v1064_v55  ;;  %v1161_v58 = vperm.slane %v2844_v57, 0 }
 0x793   :  { %v1067_v60 = vmul.f32 0.0625, %v1066_v59 }
 0x795   :  { %v1068_v61 = vsub.f32 %v1054_v48, %v1067_v60  ;;  %v1069_v62 = vsub.f32 %v1056_v50, %v1067_v60 }
 0x797   :  { %v1070_v63 = vmul.f32 %v1068_v61, %v1068_v61  ;;  %v1071_v0 = vmul.f32 %v1069_v62, %v1069_v62 }
 0x799   :  { %v1072_v1 = vmul.f32 %v1070_v63, %v2679_v41  ;;  %v1073_v2 = vmul.f32 %v1071_v0, %v2682_v47 }
 0x79b   :  { %v1074_v3 = vadd.f32 %v1073_v2, %v1072_v1  ;;  %v1244_v2 = vperm.slane %v2844_v57, 1 }
 0x79d   :  { %v1075_v5 = vrot.slane %v1074_v3, 4 }
 0x79f   :  { %v1076_v7 = vadd.f32 %v1075_v5, %v1074_v3 }
 0x7a1   :  { %v1077_v9 = vrot.slane %v1076_v7, 2 }
 0x7a3   :  { %v1078_v10 = vadd.f32 %v1077_v9, %v1076_v7 }
 0x7a5   :  { %v1079_v11 = vrot.slane %v1078_v10, 1 }
 0x7a7   :  { %v1080_v12 = vadd.f32 %v1079_v11, %v1078_v10 }
 0x7a9   :  { %v1081_v13 = vmul.f32 0.0625, %v1080_v12 }
 0x7ab   :  { %v1082_v15 = vadd.f32 1e-05, %v1081_v13 }
 0x7ad   :  { %2478 = vrsqrt.f32 %v1082_v15  ;;  %vm1089_vm11 = vweird.f32 %v1082_v15 }
 0x7b3   :  { %v2479_v4 = vpop.eup %2478 }
 0x7b4   :  { %v1084_v18 = vmul.f32 %v2479_v4, %v1082_v15  ;;  %vm1090_vm10 = vweird.f32 %v2479_v4 }
 0x7b5   :  { %vm1091_vm12 = vmor %vm1089_vm11, %vm1090_vm10 }
 0x7b6   :  { %v1085_v19 = vmul.f32 %v2479_v4, %v1084_v18 }
 0x7b8   :  { %v1086_v20 = vmul.f32 0.5, %v1085_v19 }
 0x7ba   :  { %v1087_v21 = vsub.f32 1.5, %v1086_v20 }
 0x7bc   :  { %v1088_v22 = vmul.f32 %v2479_v4, %v1087_v21 }
 0x7be   :  { %v1092_v24 = vsel %vm1091_vm12, %v2479_v4, %v1088_v22 }
 0x7bf   :  { %v1093_v25 = vmul.f32 %v1092_v24, %v1068_v61  ;;  %v1094_v26 = vmul.f32 %v1092_v24, %v1069_v62 }
 0x7c1   :  { %v1096_v28 = vmul.f32 %v1095_v23, %v1093_v25  ;;  %v1097_v29 = vmul.f32 %v1095_v23, %v1094_v26 }
 0x7c3   :  { %v1100_v30 = vadd.f32 %v1098_v27, %v1097_v29  ;;  %v1099_v31 = vadd.f32 %v1098_v27, %v1096_v28 }
 0x7c5   :  { %v1102_v33 = vmax.f32 %v1100_v30, 0.0  ;;  %v1101_v34 = vmax.f32 %v1099_v31, 0.0  ;;  %v1375_v30 = vld [vmem:[%s2976_s4] sm:$0xff]  ;;  %v2440_v31 = vld [vmem:[%s2982_s10 + $0x38] sm:$0xff] }
 0x7c6   :  { %1378 = vperm.xlu1 %2471, %v1375_v30   ;;  %1448 = vmatpush.bf16.msra.mxu1 %v2440_v31 }
 0x7c7   :  { %v1105_v32 = vpack.c.bf16 %v1102_v33, %v1101_v34  ;;  %v2438_v34 = vld [vmem:[%s2982_s10 + $0x28] sm:$0xff] }
 0x7c9   :  { %1136 = vmatpush.bf16.msrb.mxu3 %v1105_v32  ;;  %v2437_v32 = vld [vmem:[%s2982_s10 + $0x20] sm:$0xff] }
 0x7cc   :  { %2088 = vmatmul.msk.bf16.vlgmr.msrb.gmra.mxu3 %vm99_vm0, %v2640_v6  ;;  %v2417_v6 = vld [vmem:[%s2979_s7 + $0x100] sm:$0xff] }
 0x7cd   :  { %1217 = vmatpush.bf16.msrb.mxu2 %v2417_v6  ;;  %1293 = vmatpush.bf16.msra.mxu3 %v2432_v39 }
 0x7d1   :  { %1294 = vmatpush.bf16.msra.mxu3 %v2431_v40  ;;  %v2435_v40 = vld [vmem:[%s2982_s10 + $0x10] sm:$0xff] }
 0x7d5   :  { %1295 = vmatpush.bf16.msra.mxu3 %v2430_v42 }
 0x7d9   :  { %1296 = vmatpush.bf16.msra.mxu3 %v2429_v43  ;;  %v1344_v43 = vperm.slane %v2844_v57, 2 }
 0x7dd   :  { %1297 = vmatpush.bf16.msra.mxu3 %v2428_v52 }
 0x7e1   :  { %1298 = vmatpush.bf16.msra.mxu3 %v2427_v53 }
 0x7e5   :  { %1299 = vmatpush.bf16.msra.mxu3 %v2426_v54  ;;  %v1351_v54 = vld [vmem:[%s2975_s3] sm:$0xff] }
 0x7e9   :  { %1300 = vmatpush.bf16.msra.mxu3 %v2425_v56  ;;  %v2433_v56 = vld [vmem:[%s2982_s10] sm:$0xff] }
 0x84f   :  { %v1138_v45 = vpop.f32.mrf.mxu3 }
 0x850   :  { %v1139_v49 = vadd.f32 %v1138_v45, %v1124_v44  ;;  %v2434_v45 = vld [vmem:[%s2982_s10 + $0x8] sm:$0xff] }
 0x857   :  { %v1140_v48 = vpop.f32.mrf.mxu3 }
 0x858   :  { %v1141_v50 = vadd.f32 %v1140_v48, %v1126_v46 }
 0x85a   :  { %v1143_v51 = vpack.c.bf16 %v1141_v50, %v1139_v49  ;;  %v1347_v49 = vperm.slane %v2844_v57, 3  ;;  %v2448_v57 = vld [vmem:[%s2982_s10 + $0x78] sm:$0xff] }
 0x85c   :  { %1218 = vmatmul.bf16.vlgmr.msrb.gmra.mxu2 %v1143_v51 }
 0x8df   :  { %v1219_v55 = vpop.f32.mrf.mxu2 }
 0x8e0   :  { %v1220_v59 = vadd.f32 %v1219_v55, %v1161_v58  ;;  %v2447_v55 = vld [vmem:[%s2982_s10 + $0x70] sm:$0xff] }
 0x8e2   :  { %v1224_v62 = vmax.f32 %v1220_v59, 0.0  ;;  %v2445_v59 = vld [vmem:[%s2982_s10 + $0x60] sm:$0xff] }
 0x8e7   :  { %v1221_v60 = vpop.f32.mrf.mxu2 }
 0x8e8   :  { %v1222_v61 = vadd.f32 %v1221_v60, %v1161_v58  ;;  %v2446_v58 = vld [vmem:[%s2982_s10 + $0x68] sm:$0xff]  ;;  %v2444_v60 = vld [vmem:[%s2982_s10 + $0x58] sm:$0xff] }
 0x8ea   :  { %v1225_v63 = vmax.f32 %v1222_v61, 0.0  ;;  %v2443_v61 = vld [vmem:[%s2982_s10 + $0x50] sm:$0xff] }
 0x8ec   :  { %v1226_v0 = vpack.c.bf16 %v1225_v63, %v1224_v62  ;;  %v2442_v62 = vld [vmem:[%s2982_s10 + $0x48] sm:$0xff]  ;;  %v1379_v63 = vpop.permute.xlu1 %1378 }
 0x8ee   :  { %1301 = vmatmul.bf16.vlgmr.msra.gmra.mxu3 %v1226_v0 }
 0x971   :  { %v1302_v1 = vpop.f32.mrf.mxu3 }
 0x972   :  { %v1303_v3 = vadd.f32 %v1302_v1, %v1244_v2 }
 0x974   :  { %v1307_v8 = vmul.f32 %v1303_v3, %v2679_v41 }
 0x979   :  { %v1304_v5 = vpop.f32.mrf.mxu3 }
 0x97a   :  { %v1305_v7 = vadd.f32 %v1304_v5, %v1244_v2  ;;  %v2912_v5 = vld [vmem:[%s2983_s11] sm:$0xf] }
 0x97c   :  { %v1308_v9 = vmul.f32 %v1305_v7, %v2682_v47 }
 0x97e   :  { %v1309_v10 = vadd.f32 %v1308_v9, %v1307_v8 }
 0x980   :  { %v1310_v11 = vrot.slane %v1309_v10, 4 }
 0x982   :  { %v1311_v12 = vadd.f32 %v1310_v11, %v1309_v10 }
 0x984   :  { %v1312_v13 = vrot.slane %v1311_v12, 2 }
 0x986   :  { %v1313_v15 = vadd.f32 %v1312_v13, %v1311_v12  ;;  %v2456_v12 = vld [vmem:[%s2982_s10 + $0xb8] sm:$0xff]  ;;  %v2455_v13 = vld [vmem:[%s2982_s10 + $0xb0] sm:$0xff] }
 0x987   :  { %1624 = vmatpush.bf16.msra.mxu2 %v2456_v12 }
 0x988   :  { %v1314_v16 = vrot.slane %v1313_v15, 1 }
 0x98a   :  { %v1315_v14 = vadd.f32 %v1314_v16, %v1313_v15  ;;  %v2454_v15 = vld [vmem:[%s2982_s10 + $0xa8] sm:$0xff]  ;;  %v2453_v16 = vld [vmem:[%s2982_s10 + $0xa0] sm:$0xff] }
 0x98b   :  { %1625 = vmatpush.bf16.msra.mxu2 %v2455_v13 }
 0x98c   :  { %v1316_v17 = vmul.f32 0.0625, %v1315_v14  ;;  %v2452_v14 = vld [vmem:[%s2982_s10 + $0x98] sm:$0xff] }
 0x98e   :  { %v1317_v4 = vsub.f32 %v1303_v3, %v1316_v17  ;;  %v1318_v18 = vsub.f32 %v1305_v7, %v1316_v17  ;;  %v2441_v3 = vld [vmem:[%s2982_s10 + $0x40] sm:$0xff]  ;;  %v1399_v7 = vperm.slane %v2912_v5, 0  ;;  %v2451_v17 = vld [vmem:[%s2982_s10 + $0x90] sm:$0xff] }
 0x98f   :  { %1626 = vmatpush.bf16.msra.mxu2 %v2454_v15 }
 0x990   :  { %v1319_v19 = vmul.f32 %v1317_v4, %v1317_v4  ;;  %v1320_v20 = vmul.f32 %v1318_v18, %v1318_v18 }
 0x992   :  { %v1321_v21 = vmul.f32 %v1319_v19, %v2679_v41  ;;  %v1322_v22 = vmul.f32 %v1320_v20, %v2682_v47  ;;  %v2439_v41 = vld [vmem:[%s2982_s10 + $0x30] sm:$0xff]  ;;  %v1480_v19 = vperm.slane %v2912_v5, 1 }
 0x993   :  { %1449 = vmatpush.bf16.msra.mxu1 %v2439_v41  ;;  %1627 = vmatpush.bf16.msra.mxu2 %v2453_v16 }
 0x994   :  { %v1323_v23 = vadd.f32 %v1322_v22, %v1321_v21 }
 0x996   :  { %v1324_v24 = vrot.slane %v1323_v23, 4 }
 0x997   :  { %1450 = vmatpush.bf16.msra.mxu1 %v2438_v34  ;;  %1628 = vmatpush.bf16.msra.mxu2 %v2452_v14 }
 0x998   :  { %v1325_v25 = vadd.f32 %v1324_v24, %v1323_v23 }
 0x99a   :  { %v1326_v26 = vrot.slane %v1325_v25, 2 }
 0x99b   :  { %1451 = vmatpush.bf16.msra.mxu1 %v2437_v32  ;;  %1629 = vmatpush.bf16.msra.mxu2 %v2451_v17 }
 0x99c   :  { %v1327_v27 = vadd.f32 %v1326_v26, %v1325_v25 }
 0x99e   :  { %v1328_v28 = vrot.slane %v1327_v27, 1 }
 0x99f   :  { %1452 = vmatpush.bf16.msra.mxu1 %v2436_v38  ;;  %v2462_v38 = vld [vmem:[%s2982_s10 + $0xe8] sm:$0xff] }
 0x9a0   :  { %v1329_v29 = vadd.f32 %v1328_v28, %v1327_v27 }
 0x9a2   :  { %v1330_v33 = vmul.f32 0.0625, %v1329_v29 }
 0x9a3   :  { %1453 = vmatpush.bf16.msra.mxu1 %v2435_v40  ;;  %v2459_v40 = vld [vmem:[%s2982_s10 + $0xd0] sm:$0xff] }
 0x9a4   :  { %v1331_v47 = vadd.f32 1e-05, %v1330_v33 }
 0x9a6   :  { %2480 = vrsqrt.f32 %v1331_v47  ;;  %vm1338_vm14 = vweird.f32 %v1331_v47 }
 0x9a7   :  { %1454 = vmatpush.bf16.msra.mxu1 %v2434_v45 }
 0x9ab   :  { %1455 = vmatpush.bf16.msra.mxu1 %v2433_v56 }
 0x9ac   :  { %v2481_v36 = vpop.eup %2480 }
 0x9ad   :  { %v1333_v35 = vmul.f32 %v2481_v36, %v1331_v47  ;;  %vm1339_vm13 = vweird.f32 %v2481_v36 }
 0x9ae   :  { %vm1340_vm15 = vmor %vm1338_vm14, %vm1339_vm13 }
 0x9af   :  { %v1334_v37 = vmul.f32 %v2481_v36, %v1333_v35  ;;  %v2464_v35 = vld [vmem:[%s2982_s10 + $0xf8] sm:$0xff] }
 0x9b0   :  { %1719 = vmatpush.bf16.msrb.mxu3 %v2464_v35 }
 0x9b1   :  { %v1335_v6 = vmul.f32 0.5, %v1334_v37  ;;  %v2463_v37 = vld [vmem:[%s2982_s10 + $0xf0] sm:$0xff] }
 0x9b3   :  { %v1336_v39 = vsub.f32 1.5, %v1335_v6  ;;  %v2461_v6 = vld [vmem:[%s2982_s10 + $0xe0] sm:$0xff] }
 0x9b4   :  { %1720 = vmatpush.bf16.msrb.mxu3 %v2463_v37 }
 0x9b5   :  { %v1337_v42 = vmul.f32 %v2481_v36, %v1336_v39  ;;  %v2460_v39 = vld [vmem:[%s2982_s10 + $0xd8] sm:$0xff] }
 0x9b7   :  { %v1341_v44 = vsel %vm1340_vm15, %v2481_v36, %v1337_v42  ;;  %v2458_v42 = vld [vmem:[%s2982_s10 + $0xc8] sm:$0xff] }
 0x9b8   :  { %v1342_v46 = vmul.f32 %v1341_v44, %v1317_v4  ;;  %v1343_v48 = vmul.f32 %v1341_v44, %v1318_v18  ;;  %v2450_v4 = vld [vmem:[%s2982_s10 + $0x88] sm:$0xff]  ;;  %v2449_v18 = vld [vmem:[%s2982_s10 + $0x80] sm:$0xff]  ;;  %1721 = vmatpush.bf16.msrb.mxu3 %v2462_v38  ;;  %v1575_v44 = vperm.slane %v2912_v5, 2 }
 0x9b9   :  { %1630 = vmatpush.bf16.msra.mxu2 %v2450_v4 }
 0x9ba   :  { %v1346_v50 = vmul.f32 %v1344_v43, %v1343_v48  ;;  %v1345_v51 = vmul.f32 %v1344_v43, %v1342_v46  ;;  %v2457_v43 = vld [vmem:[%s2982_s10 + $0xc0] sm:$0xff] }
 0x9bc   :  { %v1349_v52 = vadd.f32 %v1347_v49, %v1346_v50  ;;  %v1348_v53 = vadd.f32 %v1347_v49, %v1345_v51  ;;  %1722 = vmatpush.bf16.msrb.mxu3 %v2461_v6 }
 0x9bd   :  { %1631 = vmatpush.bf16.msra.mxu2 %v2449_v18 }
 0x9be   :  { %1369 = vmatpush.msrb.mxu0 %v1349_v52 }
 0x9c0   :  { %1370 = vmatpush.msrb.mxu0 %v1348_v53  ;;  %1723 = vmatpush.bf16.msrb.mxu3 %v2460_v39 }
 0x9c1   :  { %2169 = vmatmul.msk.f32.vlgmr.msrb.gmra.mxu0 %vm99_vm0, %v1351_v54 }
 0x9c2   :  { %1529 = vmatpush.bf16.msra.mxu0 %v2448_v57 }
 0x9c4   :  { %1724 = vmatpush.bf16.msrb.mxu3 %v2459_v40 }
 0x9c6   :  { %1530 = vmatpush.bf16.msra.mxu0 %v2447_v55 }
 0x9c8   :  { %1725 = vmatpush.bf16.msrb.mxu3 %v2458_v42 }
 0x9ca   :  { %1531 = vmatpush.bf16.msra.mxu0 %v2446_v58 }
 0x9cc   :  { %1726 = vmatpush.bf16.msrb.mxu3 %v2457_v43 }
 0x9ce   :  { %1532 = vmatpush.bf16.msra.mxu0 %v2445_v59 }
 0x9d2   :  { %1533 = vmatpush.bf16.msra.mxu0 %v2444_v60 }
 0x9d6   :  { %1534 = vmatpush.bf16.msra.mxu0 %v2443_v61 }
 0x9da   :  { %1535 = vmatpush.bf16.msra.mxu0 %v2442_v62 }
 0x9de   :  { %1536 = vmatpush.bf16.msra.mxu0 %v2441_v3 }
 0xa3e   :  { %v1372_v0 = vpop.f32.mrf.mxu0 }
 0xa3f   :  { %v1381_v1 = vmul.f32 %v1379_v63, %v1372_v0  ;;  %v1670_v0 = vperm.slane %v2912_v5, 3 }
 0xa41   :  { %v1382_v2 = vpack.c.bf16 %v1381_v1, %v1381_v1 }
 0xa43   :  { %1456 = vmatmul.bf16.vlgmr.msra.gmra.mxu1 %v1382_v2 }
 0xac0   :  { %v1457_v8 = vpop.f32.mrf.mxu1 }
 0xac1   :  { %v1458_v9 = vadd.f32 %v1457_v8, %v1399_v7 }
 0xac3   :  { %1461 = vst [vmem:[%s2984_s12] sm:$0xff] %v1458_v9  ;;  %v1462_v10 = vpack.c.bf16 %v1458_v9, %v1458_v9 }
 0xac5   :  { %1537 = vmatmul.bf16.vlgmr.msra.gmra.mxu0 %v1462_v10 }
 0xac8   :  { %v1459_v11 = vpop.f32.mrf.mxu1 }
 0xb42   :  { %v1538_v20 = vpop.f32.mrf.mxu0 }
 0xb43   :  { %v1539_v21 = vadd.f32 %v1538_v20, %v1480_v19 }
 0xb45   :  { %v1543_v22 = vand.u32 2147483647, %v1539_v21  ;;  %v1542_v47 = vmax.f32 %v1539_v21, 0.0 }
 0xb47   :  { %v1544_v23 = vsub.f32 0.0, %v1543_v22 }
 0xb49   :  { %v1545_v24 = vmul.f32 1.442695, %v1544_v23 }
 0xb4a   :  { %v1540_v25 = vpop.f32.mrf.mxu0 }
 0xb4b   :  { %2482 = vpow2.f32 %v1545_v24 }
 0xb51   :  { %v2483_v26 = vpop.eup %2482 }
 0xb52   :  { %v1547_v27 = vadd.f32 1.0, %v2483_v26  ;;  %v1550_v28 = vmul.f32 -0.5, %v2483_v26  ;;  %v1553_v30 = vand.u32 2147483647, %v2483_v26 }
 0xb54   :  { %2484 = vlog2.f32 %v1547_v27  ;;  %v1551_v29 = vadd.f32 1.0, %v1550_v28  ;;  %vm1554_vm0 = vcmp.lt.f32.partialorder %v1553_v30, 0.0004427343 }
 0xb56   :  { %v1552_v41 = vmul.f32 %v2483_v26, %v1551_v29 }
 0xb5a   :  { %v2485_v31 = vpop.eup %2484 }
 0xb5b   :  { %v1549_v33 = vmul.f32 0.6931472, %v2485_v31 }
 0xb5d   :  { %v1555_v34 = vsel %vm1554_vm0, %v1552_v41, %v1549_v33 }
 0xb5e   :  { %v1556_v32 = vadd.f32 %v1555_v34, %v1542_v47 }
 0xb60   :  { %v1557_v36 = vpack.c.bf16 %v1556_v32, %v1556_v32 }
 0xb62   :  { %1632 = vmatmul.bf16.vlgmr.msra.gmra.mxu2 %v1557_v36 }
 0xbe5   :  { %v1633_v45 = vpop.f32.mrf.mxu2 }
 0xbe6   :  { %v1634_v46 = vadd.f32 %v1633_v45, %v1575_v44 }
 0xbe8   :  { %v1638_v48 = vand.u32 2147483647, %v1634_v46  ;;  %v1637_v60 = vmax.f32 %v1634_v46, 0.0 }
 0xbea   :  { %v1639_v49 = vsub.f32 0.0, %v1638_v48 }
 0xbec   :  { %v1640_v50 = vmul.f32 1.442695, %v1639_v49 }
 0xbed   :  { %v1635_v51 = vpop.f32.mrf.mxu2 }
 0xbee   :  { %2486 = vpow2.f32 %v1640_v50 }
 0xbf4   :  { %v2487_v52 = vpop.eup %2486 }
 0xbf5   :  { %v1642_v53 = vadd.f32 1.0, %v2487_v52  ;;  %v1645_v54 = vmul.f32 -0.5, %v2487_v52  ;;  %v1648_v57 = vand.u32 2147483647, %v2487_v52 }
 0xbf7   :  { %2488 = vlog2.f32 %v1642_v53  ;;  %v1646_v56 = vadd.f32 1.0, %v1645_v54  ;;  %vm1649_vm1 = vcmp.lt.f32.partialorder %v1648_v57, 0.0004427343 }
 0xbf9   :  { %v1647_v59 = vmul.f32 %v2487_v52, %v1646_v56 }
 0xbfd   :  { %v2489_v55 = vpop.eup %2488 }
 0xbfe   :  { %v1644_v58 = vmul.f32 0.6931472, %v2489_v55 }
 0xc00   :  { %v1650_v61 = vsel %vm1649_vm1, %v1647_v59, %v1644_v58 }
 0xc01   :  { %v1651_v62 = vadd.f32 %v1650_v61, %v1637_v60 }
 0xc03   :  { %v1652_v63 = vpack.c.bf16 %v1651_v62, %v1651_v62 }
 0xc05   :  { %1727 = vmatmul.bf16.vlgmr.msrb.gmra.mxu3 %v1652_v63 }
 0xc88   :  { %v1728_v1 = vpop.f32.mrf.mxu3 }
 0xc89   :  { %v1729_v2 = vadd.f32 %v1728_v1, %v1670_v0 }
 0xc8b   :  { %1732 = vst [vmem:[%s2985_s13] sm:$0xff] %v1729_v2 }
 0xc90   :  { %v1730_v3 = vpop.f32.mrf.mxu3 }
 0xc91   :  { %1741 = vsyncpa [#allocation3], 1 }
 0xc92   :  { %1742 = vsyncpa [#allocation5], 1 }

</bundles_post_ra>
